<compile_context>
chip_gen: v6e
topology: v6e:2x2x1
jax: 0.10.0
libtpu: 0.0.40
codegen_flags: <defaults>
</compile_context>

<pallas_src>
import jax
import jax.numpy as jnp
from jax.experimental import pallas as pl
from jax.experimental.pallas import tpu as pltpu

EPS = 1e-5                    # nn.BatchNorm2d default eps
VMEM_LIMIT = 32 * 1024 * 1024  # safe on v5e/v6e (128 MiB) and v7x (64 MiB)


def _ceil_to(x, m):
    return (x + m - 1) // m * m


def _pad2d(x, rp, cp):
    r, c = x.shape
    if r == rp and c == cp:
        return x
    return jnp.pad(x, ((0, rp - r), (0, cp - c)))


# ----------------------------------------------------------------------------
# Pallas kernels: tiled matmul + bias (MXU, bf16 inputs, f32 accumulation)
# ----------------------------------------------------------------------------
def _mm_kernel_f32(a_ref, b_ref, bias_ref, o_ref):
    """f32 output: accumulate directly into the K-resident output block."""
    @pl.when(pl.program_id(2) == 0)
    def _init():
        o_ref[...] = jnp.zeros_like(o_ref)

    o_ref[...] += jnp.dot(a_ref[...], b_ref[...],
                          preferred_element_type=jnp.float32)

    @pl.when(pl.program_id(2) == pl.num_programs(2) - 1)
    def _finalize():
        o_ref[...] += bias_ref[...]


def _mm_kernel_cast(a_ref, b_ref, bias_ref, o_ref, acc_ref):
    """Narrow (e.g. bf16) output: f32 scratch accumulator, cast on final store."""
    @pl.when(pl.program_id(2) == 0)
    def _init():
        acc_ref[...] = jnp.zeros_like(acc_ref)

    acc_ref[...] += jnp.dot(a_ref[...], b_ref[...],
                            preferred_element_type=jnp.float32)

    @pl.when(pl.program_id(2) == pl.num_programs(2) - 1)
    def _finalize():
        o_ref[...] = (acc_ref[...] + bias_ref[...]).astype(o_ref.dtype)


def _pick_tile(dim_padded, candidates=(512, 256, 128)):
    for t in candidates:
        if dim_padded % t == 0:
            return t
    return 128


def matmul_bias(a, b, bias, out_dtype=jnp.float32):
    """(M,K) @ (K,N) + bias(N,).  a is cast to bf16 (activations / patches),
    b to bf16, accumulation in f32.  K/N zero-padded to 128 multiples so the
    output is lane-dense; M/N grid axes are 'parallel' for megacore."""
    M, K = a.shape
    _, N = b.shape

    Np = _ceil_to(N, 128)
    Kp = _ceil_to(K, 128)
    tn = _pick_tile(Np)
    tk = _pick_tile(Kp)
    tm = min(512, _ceil_to(M, 16))
    Mp = _ceil_to(M, tm)
    # v7x megacore: if N collapses to one block, split M so both TCs get work.
    if Np // tn == 1 and Mp // tm == 1 and tm >= 32:
        tm = max(16, _ceil_to(tm // 2, 16))
        Mp = _ceil_to(M, tm)

    a_p = _pad2d(a.astype(jnp.bfloat16), Mp, Kp)
    b_p = _pad2d(b.astype(jnp.bfloat16), Kp, Np)
    bias_p = _pad2d(bias.reshape(1, N).astype(jnp.float32), 1, Np)

    out_is_f32 = jnp.dtype(out_dtype) == jnp.dtype(jnp.float32)
    kernel = _mm_kernel_f32 if out_is_f32 else _mm_kernel_cast
    scratch = [] if out_is_f32 else [pltpu.VMEM((tm, tn), jnp.float32)]

    out = pl.pallas_call(
        kernel,
        out_shape=jax.ShapeDtypeStruct((Mp, Np), out_dtype),
        grid_spec=pltpu.PrefetchScalarGridSpec(
            num_scalar_prefetch=0,
            grid=(Mp // tm, Np // tn, Kp // tk),
            in_specs=[
                pl.BlockSpec((tm, tk), lambda i, j, k: (i, k)),
                pl.BlockSpec((tk, tn), lambda i, j, k: (k, j)),
                pl.BlockSpec((1, tn), lambda i, j, k: (0, j)),
            ],
            out_specs=pl.BlockSpec((tm, tn), lambda i, j, k: (i, j)),
            scratch_shapes=scratch,
        ),
        compiler_params=pltpu.CompilerParams(
            dimension_semantics=("parallel", "parallel", "arbitrary"),
            vmem_limit_bytes=VMEM_LIMIT),
    )(a_p, b_p, bias_p)
    if Mp != M or Np != N:
        out = out[:M, :N]
    return out


# ----------------------------------------------------------------------------
# Pallas kernels: fused elementwise passes (NHWC: rows = H*W, lanes = C)
# ----------------------------------------------------------------------------
def _stats_kernel(y1_ref, y2_ref, o_ref):
    """Pass A (read-only): per-(sample, channel) sums of y, y^2 for both
    inputs plus sum|y1-y2|, accumulated across row tiles into one (1,8,C)
    resident output block.  The per-sample scale w is applied later in JAX
    (sum(w*y)=w*sum(y), sum((w*y)^2)=w^2*sum(y^2), sum|w*(y1-y2)|=w*sum|y1-y2|)."""
    @pl.when(pl.program_id(1) == 0)
    def _init():
        o_ref[...] = jnp.zeros_like(o_ref)

    y1 = y1_ref[...]                               # (1, tr, C) f32
    y2 = y2_ref[...]
    o_ref[:, 0:1, :] += jnp.sum(y1, axis=1, keepdims=True)
    o_ref[:, 1:2, :] += jnp.sum(y1 * y1, axis=1, keepdims=True)
    o_ref[:, 2:3, :] += jnp.sum(y2, axis=1, keepdims=True)
    o_ref[:, 3:4, :] += jnp.sum(y2 * y2, axis=1, keepdims=True)
    o_ref[:, 4:5, :] += jnp.sum(jnp.abs(y1 - y2), axis=1, keepdims=True)


def _affine_relu_kernel(x_ref, a_ref, b_ref, o_ref):
    """Pass B: out = relu(x*a + b), a/b per-(sample,channel) lane vectors
    (scale w folded into the BN affine).  f32 math, cast on store."""
    y = x_ref[...] * a_ref[...] + b_ref[...]
    o_ref[...] = jnp.maximum(y, 0.0).astype(o_ref.dtype)


def _spatial_tile(hw, c, budget_bytes=4 << 20):
    per_row = max(c, 1) * 4
    tr = max(8, (budget_bytes // per_row) // 8 * 8)
    return min(tr, _ceil_to(hw, 8))


def _stats_pallas(yf, n, tr):
    """yf: (2N, HWp, C) f32 (x1 rows [:N], x2 rows [N:]).  Returns (N,8,C)."""
    two_n, hwp, c = yf.shape
    return pl.pallas_call(
        _stats_kernel,
        out_shape=jax.ShapeDtypeStruct((n, 8, c), jnp.float32),
        grid=(n, hwp // tr),
        in_specs=[
            pl.BlockSpec((1, tr, c), lambda i, r: (i, r, 0)),
            pl.BlockSpec((1, tr, c), lambda i, r: (i + n, r, 0)),
        ],
        out_specs=pl.BlockSpec((1, 8, c), lambda i, r: (i, 0, 0)),
        compiler_params=pltpu.CompilerParams(
            dimension_semantics=("parallel", "arbitrary"),
            vmem_limit_bytes=VMEM_LIMIT),
    )(yf, yf)


def _affine_relu_pallas(yf, a_rows, b_rows, tr, out_dtype):
    two_n, hwp, c = yf.shape
    return pl.pallas_call(
        _affine_relu_kernel,
        out_shape=jax.ShapeDtypeStruct((two_n, hwp, c), out_dtype),
        grid=(two_n, hwp // tr),
        in_specs=[
            pl.BlockSpec((1, tr, c), lambda i, r: (i, r, 0)),
            pl.BlockSpec((1, 1, c), lambda i, r: (i, 0, 0)),
            pl.BlockSpec((1, 1, c), lambda i, r: (i, 0, 0)),
        ],
        out_specs=pl.BlockSpec((1, tr, c), lambda i, r: (i, r, 0)),
        compiler_params=pltpu.CompilerParams(
            dimension_semantics=("parallel", "parallel"),
            vmem_limit_bytes=VMEM_LIMIT),
    )(yf, a_rows, b_rows)


# ----------------------------------------------------------------------------
# Glue (NHWC, reshapes / tiny reductions) in plain JAX
# ----------------------------------------------------------------------------
def conv2d_nhwc(x, w, b, stride, pad, out_dtype=jnp.float32):
    """NHWC conv via im2col (bf16 taps) + Pallas tiled matmul.
    x: (N,H,W,Cin); w: (Cout,Cin,kh,kw) f32; b: (Cout,)."""
    n, h, wd, cin = x.shape
    cout, _, kh, kw = w.shape
    xb = x.astype(jnp.bfloat16)                    # cast BEFORE building taps
    xp = jnp.pad(xb, ((0, 0), (pad, pad), (pad, pad), (0, 0)))
    ho = (h + 2 * pad - kh) // stride + 1
    wo = (wd + 2 * pad - kw) // stride + 1
    cols = []
    for i in range(kh):
        for j in range(kw):
            cols.append(xp[:, i:i + stride * ho:stride,
                           j:j + stride * wo:stride, :])
    patches = jnp.concatenate(cols, axis=-1).reshape(n * ho * wo, kh * kw * cin)
    wm = jnp.transpose(w, (2, 3, 1, 0)).reshape(kh * kw * cin, cout)
    out = matmul_bias(patches, wm, b, out_dtype=out_dtype)
    return out.reshape(n, ho, wo, cout)


def maxpool2x2_nhwc(x):
    n, h, w, c = x.shape
    return x.reshape(n, h // 2, 2, w // 2, 2, c).max(axis=(2, 4))


def scale_bn_relu(yb, w, gamma, beta, n, out_dtype):
    """yb: (2N,H,W,C) f32 conv output (x1 rows [:N], x2 rows [N:]);
    w: (N,C) sigmoid weights.  Computes s=w*y, cycle loss mean|s1-s2|,
    per-call training-mode BN batch stats of s (per input, like PyTorch),
    and applies a single fused affine+ReLU with w folded into the BN affine."""
    two_n, h, wd, c = yb.shape
    hw = h * wd
    tr = _spatial_tile(hw, c)
    hwp = _ceil_to(hw, tr)
    yf = yb.reshape(two_n, hw, c)
    if hwp != hw:
        yf = jnp.pad(yf, ((0, 0), (0, hwp - hw), (0, 0)))   # zeros: stats-safe

    stats = _stats_pallas(yf, n, tr)                        # (N, 8, C)
    s1, q1 = stats[:, 0, :], stats[:, 1, :]
    s2, q2 = stats[:, 2, :], stats[:, 3, :]
    d = stats[:, 4, :]
    cnt = n * hw

    loss = jnp.sum(w * d) / (cnt * c)

    def coeffs(s, q):
        mean = jnp.sum(w * s, axis=0) / cnt
        ex2 = jnp.sum(w * w * q, axis=0) / cnt
        var = jnp.maximum(ex2 - mean * mean, 0.0)           # biased batch var
        a = gamma / jnp.sqrt(var + EPS)
        b = beta - mean * a
        return a, b

    a1, b1 = coeffs(s1, q1)
    a2, b2 = coeffs(s2, q2)
    a_rows = jnp.concatenate([w * a1[None, :], w * a2[None, :]], axis=0)
    b_rows = jnp.concatenate([jnp.broadcast_to(b1, (n, c)),
                              jnp.broadcast_to(b2, (n, c))], axis=0)

    out = _affine_relu_pallas(yf, a_rows.reshape(two_n, 1, c),
                              b_rows.reshape(two_n, 1, c), tr, out_dtype)
    if hwp != hw:
        out = out[:, :hw, :]
    return out.reshape(two_n, h, wd, c), loss


def weight_learning(p, y1, y2):
    """y1,y2: (N,H,W,C).  Returns per-(sample,channel) sigmoid weights (N,C)."""
    x = jnp.concatenate([y1.astype(jnp.bfloat16), y2.astype(jnp.bfloat16)],
                        axis=-1)                            # channel concat
    x = conv2d_nhwc(x, p["w1"], p["b1"], stride=2, pad=1,
                    out_dtype=jnp.bfloat16)                 # feeds next bf16 MXU
    x = conv2d_nhwc(x, p["w2"], p["b2"], stride=2, pad=1,
                    out_dtype=jnp.float32)
    x = jnp.mean(x, axis=(1, 2))                            # AdaptiveAvgPool2d
    return jax.nn.sigmoid(x)                                # (N, C)


def double_conv(p, xb, n):
    # xb batches x1 (rows [:n]) and x2 (rows [n:]) through the shared weights.
    yb = conv2d_nhwc(xb, p["c1_w"], p["c1_b"], stride=1, pad=1,
                     out_dtype=jnp.float32)
    w1 = weight_learning(p["wl1"], yb[:n], yb[n:])
    # intermediate activation only feeds conv2 (bf16 MXU) -> store bf16
    zb, loss1 = scale_bn_relu(yb, w1, p["bn1_g"], p["bn1_b"], n,
                              out_dtype=jnp.bfloat16)
    yb2 = conv2d_nhwc(zb, p["c2_w"], p["c2_b"], stride=1, pad=1,
                      out_dtype=jnp.float32)
    w2 = weight_learning(p["wl2"], yb2[:n], yb2[n:])
    ob, loss2 = scale_bn_relu(yb2, w2, p["bn2_g"], p["bn2_b"], n,
                              out_dtype=jnp.float32)
    return ob[:n], ob[n:], (loss1 + loss2) / 2


def down_forward(params, x1, x2):
    n = x1.shape[0]
    xb = jnp.concatenate([x1, x2], axis=0)       # shared weights -> batch both
    xb = jnp.transpose(xb, (0, 2, 3, 1))         # NCHW -> NHWC once
    xb = maxpool2x2_nhwc(xb)
    o1, o2, loss = double_conv(params, xb, n)
    return (jnp.transpose(o1, (0, 3, 1, 2)),     # back to NCHW once at exit
            jnp.transpose(o2, (0, 3, 1, 2)), loss)


# ----------------------------------------------------------------------------
# Deterministic parameter init (shapes per Down(in_channels, out_channels))
# ----------------------------------------------------------------------------
def _conv_init(key, cout, cin, k=3):
    kw_, kb_ = jax.random.split(key)
    fan_in = cin * k * k
    bound = 1.0 / jnp.sqrt(fan_in)
    w = jax.random.uniform(kw_, (cout, cin, k, k), jnp.float32, -bound, bound)
    b = jax.random.uniform(kb_, (cout,), jnp.float32, -bound, bound)
    return w, b


def init_params(key, in_channels, out_channels):
    ks = jax.random.split(key, 6)
    c1_w, c1_b = _conv_init(ks[0], out_channels, in_channels)
    c2_w, c2_b = _conv_init(ks[1], out_channels, out_channels)
    wl1_w1, wl1_b1 = _conv_init(ks[2], out_channels, 2 * out_channels)
    wl1_w2, wl1_b2 = _conv_init(ks[3], out_channels, out_channels)
    wl2_w1, wl2_b1 = _conv_init(ks[4], out_channels, 2 * out_channels)
    wl2_w2, wl2_b2 = _conv_init(ks[5], out_channels, out_channels)
    return {
        "c1_w": c1_w, "c1_b": c1_b,
        "c2_w": c2_w, "c2_b": c2_b,
        "bn1_g": jnp.ones((out_channels,), jnp.float32),
        "bn1_b": jnp.zeros((out_channels,), jnp.float32),
        "bn2_g": jnp.ones((out_channels,), jnp.float32),
        "bn2_b": jnp.zeros((out_channels,), jnp.float32),
        "wl1": {"w1": wl1_w1, "b1": wl1_b1, "w2": wl1_w2, "b2": wl1_b2},
        "wl2": {"w1": wl2_w1, "b1": wl2_b1, "w2": wl2_w2, "b2": wl2_b2},
    }


if __name__ == "__main__":
    key = jax.random.PRNGKey(0)
    kx1, kx2, kp = jax.random.split(key, 3)
    in_channels, out_channels = 4, 8
    x1 = jax.random.normal(kx1, (2, in_channels, 16, 16), jnp.float32)
    x2 = jax.random.normal(kx2, (2, in_channels, 16, 16), jnp.float32)
    params = init_params(kp, in_channels, out_channels)

    fwd = jax.jit(down_forward)
    y1, y2, lossd = fwd(params, x1, x2)
    jax.block_until_ready((y1, y2, lossd))

    assert y1.shape == (2, out_channels, 8, 8)
    assert y2.shape == (2, out_channels, 8, 8)
    assert lossd.shape == ()
    assert bool(jnp.isfinite(lossd))
    print("KERNEL_OK")
</pallas_src>

<mosaic_0001>
module attributes {stable_mosaic.version = 11 : i64} {
  func.func @_mm_kernel_f32(%arg0: i32, %arg1: i32, %arg2: i32, %arg3: memref<128x128xbf16, #tpu.memory_space<vmem>>, %arg4: memref<128x128xbf16, #tpu.memory_space<vmem>>, %arg5: memref<1x128xf32, #tpu.memory_space<vmem>>, %arg6: memref<128x128xf32, #tpu.memory_space<vmem>>) attributes {dimension_semantics = [#tpu.dimension_semantics<parallel>, #tpu.dimension_semantics<parallel>, #tpu.dimension_semantics<arbitrary>], iteration_bounds = array<i64: 2, 1, 1>, scalar_prefetch = 0 : i64, scratch_operands = 0 : i64, tpu.core_type = #tpu.core_type<tc>, window_params = [{transform_indices = @transform_0, window_bounds = array<i64: 128, 128>}, {transform_indices = @transform_1, window_bounds = array<i64: 128, 128>}, {transform_indices = @transform_2, window_bounds = array<i64: 1, 128>}, {transform_indices = @transform_3, window_bounds = array<i64: 128, 128>}]} {
    %c0_i32 = arith.constant 0 : i32
    %0 = arith.cmpi eq, %arg2, %c0_i32 : i32
    %1 = arith.extui %0 : i1 to i32
    %c0_i32_0 = arith.constant 0 : i32
    %2 = arith.cmpi ne, %1, %c0_i32_0 : i32
    scf.if %2 {
      %cst_10 = arith.constant 0.000000e+00 : f32
      %12 = vector.broadcast %cst_10 : f32 to vector<128x128xf32>
      %c0_11 = arith.constant 0 : index
      %c0_12 = arith.constant 0 : index
      %13 = vector.load %arg6[%c0_11, %c0_12] : memref<128x128xf32, #tpu.memory_space<vmem>>, vector<128x128xf32>
      tpu.vector_store %arg6[%c0_11, %c0_12], %12 {strides = array<i32>} : memref<128x128xf32, #tpu.memory_space<vmem>>, vector<128x128xf32>,
    } else {
    }
    %c0 = arith.constant 0 : index
    %c0_1 = arith.constant 0 : index
    %3 = vector.load %arg6[%c0, %c0_1] : memref<128x128xf32, #tpu.memory_space<vmem>>, vector<128x128xf32>
    %c0_2 = arith.constant 0 : index
    %c0_3 = arith.constant 0 : index
    %4 = vector.load %arg3[%c0_2, %c0_3] : memref<128x128xbf16, #tpu.memory_space<vmem>>, vector<128x128xbf16>
    %c0_4 = arith.constant 0 : index
    %c0_5 = arith.constant 0 : index
    %5 = vector.load %arg4[%c0_4, %c0_5] : memref<128x128xbf16, #tpu.memory_space<vmem>>, vector<128x128xbf16>
    %cst = arith.constant dense<0.000000e+00> : vector<128x128xf32>
    %6 = tpu.matmul %4, %5, %cst {dimension_numbers = #tpu.dot_dimension_numbers<[1], [0], [0], [1], [0, 0, 1, 1], [], []>} : vector<128x128xbf16>, vector<128x128xbf16>, vector<128x128xf32> -> vector<128x128xf32>
    %7 = arith.addf %3, %6 : vector<128x128xf32>
    %c0_6 = arith.constant 0 : index
    %c0_7 = arith.constant 0 : index
    %8 = vector.load %arg6[%c0_6, %c0_7] : memref<128x128xf32, #tpu.memory_space<vmem>>, vector<128x128xf32>
    tpu.vector_store %arg6[%c0_6, %c0_7], %7 {strides = array<i32>} : memref<128x128xf32, #tpu.memory_space<vmem>>, vector<128x128xf32>,
    %c0_i32_8 = arith.constant 0 : i32
    %9 = arith.cmpi eq, %arg2, %c0_i32_8 : i32
    %10 = arith.extui %9 : i1 to i32
    %c0_i32_9 = arith.constant 0 : i32
    %11 = arith.cmpi ne, %10, %c0_i32_9 : i32
    scf.if %11 {
      %c0_10 = arith.constant 0 : index
      %c0_11 = arith.constant 0 : index
      %12 = vector.load %arg6[%c0_10, %c0_11] : memref<128x128xf32, #tpu.memory_space<vmem>>, vector<128x128xf32>
      %c0_12 = arith.constant 0 : index
      %c0_13 = arith.constant 0 : index
      %13 = vector.load %arg5[%c0_12, %c0_13] : memref<1x128xf32, #tpu.memory_space<vmem>>, vector<1x128xf32>
      %14 = vector.broadcast %13 : vector<1x128xf32> to vector<128x128xf32>
      %15 = arith.addf %12, %14 : vector<128x128xf32>
      %c0_14 = arith.constant 0 : index
      %c0_15 = arith.constant 0 : index
      %16 = vector.load %arg6[%c0_14, %c0_15] : memref<128x128xf32, #tpu.memory_space<vmem>>, vector<128x128xf32>
      tpu.vector_store %arg6[%c0_14, %c0_15], %15 {strides = array<i32>} : memref<128x128xf32, #tpu.memory_space<vmem>>, vector<128x128xf32>,
    } else {
    }
    return
  }
  func.func @transform_0(%arg0: i32, %arg1: i32, %arg2: i32) -> (i32, i32) {
    %c0_i32 = arith.constant 0 : i32
    return %arg0, %arg2 : i32, i32
  }
  func.func @transform_1(%arg0: i32, %arg1: i32, %arg2: i32) -> (i32, i32) {
    %c0_i32 = arith.constant 0 : i32
    return %arg2, %arg1 : i32, i32
  }
  func.func @transform_2(%arg0: i32, %arg1: i32, %arg2: i32) -> (i32, i32) {
    %c0_i32 = arith.constant 0 : i32
    %c0_i32_0 = arith.constant 0 : i32
    return %c0_i32, %arg1 : i32, i32
  }
  func.func @transform_3(%arg0: i32, %arg1: i32, %arg2: i32) -> (i32, i32) {
    %c0_i32 = arith.constant 0 : i32
    return %arg0, %arg1 : i32, i32
  }
}

module attributes {stable_mosaic.version = 11 : i64} {
  func.func @_mm_kernel_cast(%arg0: i32, %arg1: i32, %arg2: i32, %arg3: memref<16x256xbf16, #tpu.memory_space<vmem>>, %arg4: memref<256x128xbf16, #tpu.memory_space<vmem>>, %arg5: memref<1x128xf32, #tpu.memory_space<vmem>>, %arg6: memref<16x128xbf16, #tpu.memory_space<vmem>>, %arg7: memref<16x128xf32, #tpu.memory_space<vmem>>) attributes {dimension_semantics = [#tpu.dimension_semantics<parallel>, #tpu.dimension_semantics<parallel>, #tpu.dimension_semantics<arbitrary>], iteration_bounds = array<i64: 2, 1, 1>, scalar_prefetch = 0 : i64, scratch_operands = 1 : i64, tpu.core_type = #tpu.core_type<tc>, window_params = [{transform_indices = @transform_0, window_bounds = array<i64: 16, 256>}, {transform_indices = @transform_1, window_bounds = array<i64: 256, 128>}, {transform_indices = @transform_2, window_bounds = array<i64: 1, 128>}, {transform_indices = @transform_3, window_bounds = array<i64: 16, 128>}]} {
    %c0_i32 = arith.constant 0 : i32
    %0 = arith.cmpi eq, %arg2, %c0_i32 : i32
    %1 = arith.extui %0 : i1 to i32
    %c0_i32_0 = arith.constant 0 : i32
    %2 = arith.cmpi ne, %1, %c0_i32_0 : i32
    scf.if %2 {
      %cst_10 = arith.constant 0.000000e+00 : f32
      %12 = vector.broadcast %cst_10 : f32 to vector<16x128xf32>
      %c0_11 = arith.constant 0 : index
      %c0_12 = arith.constant 0 : index
      %13 = vector.load %arg7[%c0_11, %c0_12] : memref<16x128xf32, #tpu.memory_space<vmem>>, vector<16x128xf32>
      tpu.vector_store %arg7[%c0_11, %c0_12], %12 {strides = array<i32>} : memref<16x128xf32, #tpu.memory_space<vmem>>, vector<16x128xf32>,
    } else {
    }
    %c0 = arith.constant 0 : index
    %c0_1 = arith.constant 0 : index
    %3 = vector.load %arg7[%c0, %c0_1] : memref<16x128xf32, #tpu.memory_space<vmem>>, vector<16x128xf32>
    %c0_2 = arith.constant 0 : index
    %c0_3 = arith.constant 0 : index
    %4 = vector.load %arg3[%c0_2, %c0_3] : memref<16x256xbf16, #tpu.memory_space<vmem>>, vector<16x256xbf16>
    %c0_4 = arith.constant 0 : index
    %c0_5 = arith.constant 0 : index
    %5 = vector.load %arg4[%c0_4, %c0_5] : memref<256x128xbf16, #tpu.memory_space<vmem>>, vector<256x128xbf16>
    %cst = arith.constant dense<0.000000e+00> : vector<16x128xf32>
    %6 = tpu.matmul %4, %5, %cst {dimension_numbers = #tpu.dot_dimension_numbers<[1], [0], [0], [1], [0, 0, 1, 1], [], []>} : vector<16x256xbf16>, vector<256x128xbf16>, vector<16x128xf32> -> vector<16x128xf32>
    %7 = arith.addf %3, %6 : vector<16x128xf32>
    %c0_6 = arith.constant 0 : index
    %c0_7 = arith.constant 0 : index
    %8 = vector.load %arg7[%c0_6, %c0_7] : memref<16x128xf32, #tpu.memory_space<vmem>>, vector<16x128xf32>
    tpu.vector_store %arg7[%c0_6, %c0_7], %7 {strides = array<i32>} : memref<16x128xf32, #tpu.memory_space<vmem>>, vector<16x128xf32>,
    %c0_i32_8 = arith.constant 0 : i32
    %9 = arith.cmpi eq, %arg2, %c0_i32_8 : i32
    %10 = arith.extui %9 : i1 to i32
    %c0_i32_9 = arith.constant 0 : i32
    %11 = arith.cmpi ne, %10, %c0_i32_9 : i32
    scf.if %11 {
      %c0_10 = arith.constant 0 : index
      %c0_11 = arith.constant 0 : index
      %12 = vector.load %arg7[%c0_10, %c0_11] : memref<16x128xf32, #tpu.memory_space<vmem>>, vector<16x128xf32>
      %c0_12 = arith.constant 0 : index
      %c0_13 = arith.constant 0 : index
      %13 = vector.load %arg5[%c0_12, %c0_13] : memref<1x128xf32, #tpu.memory_space<vmem>>, vector<1x128xf32>
      %14 = vector.broadcast %13 : vector<1x128xf32> to vector<16x128xf32>
      %15 = arith.addf %12, %14 : vector<16x128xf32>
      %16 = arith.truncf %15 : vector<16x128xf32> to vector<16x128xbf16>
      %c0_14 = arith.constant 0 : index
      %c0_15 = arith.constant 0 : index
      %17 = vector.load %arg6[%c0_14, %c0_15] : memref<16x128xbf16, #tpu.memory_space<vmem>>, vector<16x128xbf16>
      tpu.vector_store %arg6[%c0_14, %c0_15], %16 {strides = array<i32>} : memref<16x128xbf16, #tpu.memory_space<vmem>>, vector<16x128xbf16>,
    } else {
    }
    return
  }
  func.func @transform_0(%arg0: i32, %arg1: i32, %arg2: i32) -> (i32, i32) {
    %c0_i32 = arith.constant 0 : i32
    return %arg0, %arg2 : i32, i32
  }
  func.func @transform_1(%arg0: i32, %arg1: i32, %arg2: i32) -> (i32, i32) {
    %c0_i32 = arith.constant 0 : i32
    return %arg2, %arg1 : i32, i32
  }
  func.func @transform_2(%arg0: i32, %arg1: i32, %arg2: i32) -> (i32, i32) {
    %c0_i32 = arith.constant 0 : i32
    %c0_i32_0 = arith.constant 0 : i32
    return %c0_i32, %arg1 : i32, i32
  }
  func.func @transform_3(%arg0: i32, %arg1: i32, %arg2: i32) -> (i32, i32) {
    %c0_i32 = arith.constant 0 : i32
    return %arg0, %arg1 : i32, i32
  }
}

module attributes {stable_mosaic.version = 11 : i64} {
  func.func @_mm_kernel_f32(%arg0: i32, %arg1: i32, %arg2: i32, %arg3: memref<16x128xbf16, #tpu.memory_space<vmem>>, %arg4: memref<128x128xbf16, #tpu.memory_space<vmem>>, %arg5: memref<1x128xf32, #tpu.memory_space<vmem>>, %arg6: memref<16x128xf32, #tpu.memory_space<vmem>>) attributes {dimension_semantics = [#tpu.dimension_semantics<parallel>, #tpu.dimension_semantics<parallel>, #tpu.dimension_semantics<arbitrary>], iteration_bounds = array<i64: 1, 1, 1>, scalar_prefetch = 0 : i64, scratch_operands = 0 : i64, tpu.core_type = #tpu.core_type<tc>, window_params = [{transform_indices = @transform_0, window_bounds = array<i64: 16, 128>}, {transform_indices = @transform_1, window_bounds = array<i64: 128, 128>}, {transform_indices = @transform_2, window_bounds = array<i64: 1, 128>}, {transform_indices = @transform_3, window_bounds = array<i64: 16, 128>}]} {
    %c0_i32 = arith.constant 0 : i32
    %0 = arith.cmpi eq, %arg2, %c0_i32 : i32
    %1 = arith.extui %0 : i1 to i32
    %c0_i32_0 = arith.constant 0 : i32
    %2 = arith.cmpi ne, %1, %c0_i32_0 : i32
    scf.if %2 {
      %cst_10 = arith.constant 0.000000e+00 : f32
      %12 = vector.broadcast %cst_10 : f32 to vector<16x128xf32>
      %c0_11 = arith.constant 0 : index
      %c0_12 = arith.constant 0 : index
      %13 = vector.load %arg6[%c0_11, %c0_12] : memref<16x128xf32, #tpu.memory_space<vmem>>, vector<16x128xf32>
      tpu.vector_store %arg6[%c0_11, %c0_12], %12 {strides = array<i32>} : memref<16x128xf32, #tpu.memory_space<vmem>>, vector<16x128xf32>,
    } else {
    }
    %c0 = arith.constant 0 : index
    %c0_1 = arith.constant 0 : index
    %3 = vector.load %arg6[%c0, %c0_1] : memref<16x128xf32, #tpu.memory_space<vmem>>, vector<16x128xf32>
    %c0_2 = arith.constant 0 : index
    %c0_3 = arith.constant 0 : index
    %4 = vector.load %arg3[%c0_2, %c0_3] : memref<16x128xbf16, #tpu.memory_space<vmem>>, vector<16x128xbf16>
    %c0_4 = arith.constant 0 : index
    %c0_5 = arith.constant 0 : index
    %5 = vector.load %arg4[%c0_4, %c0_5] : memref<128x128xbf16, #tpu.memory_space<vmem>>, vector<128x128xbf16>
    %cst = arith.constant dense<0.000000e+00> : vector<16x128xf32>
    %6 = tpu.matmul %4, %5, %cst {dimension_numbers = #tpu.dot_dimension_numbers<[1], [0], [0], [1], [0, 0, 1, 1], [], []>} : vector<16x128xbf16>, vector<128x128xbf16>, vector<16x128xf32> -> vector<16x128xf32>
    %7 = arith.addf %3, %6 : vector<16x128xf32>
    %c0_6 = arith.constant 0 : index
    %c0_7 = arith.constant 0 : index
    %8 = vector.load %arg6[%c0_6, %c0_7] : memref<16x128xf32, #tpu.memory_space<vmem>>, vector<16x128xf32>
    tpu.vector_store %arg6[%c0_6, %c0_7], %7 {strides = array<i32>} : memref<16x128xf32, #tpu.memory_space<vmem>>, vector<16x128xf32>,
    %c0_i32_8 = arith.constant 0 : i32
    %9 = arith.cmpi eq, %arg2, %c0_i32_8 : i32
    %10 = arith.extui %9 : i1 to i32
    %c0_i32_9 = arith.constant 0 : i32
    %11 = arith.cmpi ne, %10, %c0_i32_9 : i32
    scf.if %11 {
      %c0_10 = arith.constant 0 : index
      %c0_11 = arith.constant 0 : index
      %12 = vector.load %arg6[%c0_10, %c0_11] : memref<16x128xf32, #tpu.memory_space<vmem>>, vector<16x128xf32>
      %c0_12 = arith.constant 0 : index
      %c0_13 = arith.constant 0 : index
      %13 = vector.load %arg5[%c0_12, %c0_13] : memref<1x128xf32, #tpu.memory_space<vmem>>, vector<1x128xf32>
      %14 = vector.broadcast %13 : vector<1x128xf32> to vector<16x128xf32>
      %15 = arith.addf %12, %14 : vector<16x128xf32>
      %c0_14 = arith.constant 0 : index
      %c0_15 = arith.constant 0 : index
      %16 = vector.load %arg6[%c0_14, %c0_15] : memref<16x128xf32, #tpu.memory_space<vmem>>, vector<16x128xf32>
      tpu.vector_store %arg6[%c0_14, %c0_15], %15 {strides = array<i32>} : memref<16x128xf32, #tpu.memory_space<vmem>>, vector<16x128xf32>,
    } else {
    }
    return
  }
  func.func @transform_0(%arg0: i32, %arg1: i32, %arg2: i32) -> (i32, i32) {
    %c0_i32 = arith.constant 0 : i32
    return %arg0, %arg2 : i32, i32
  }
  func.func @transform_1(%arg0: i32, %arg1: i32, %arg2: i32) -> (i32, i32) {
    %c0_i32 = arith.constant 0 : i32
    return %arg2, %arg1 : i32, i32
  }
  func.func @transform_2(%arg0: i32, %arg1: i32, %arg2: i32) -> (i32, i32) {
    %c0_i32 = arith.constant 0 : i32
    %c0_i32_0 = arith.constant 0 : i32
    return %c0_i32, %arg1 : i32, i32
  }
  func.func @transform_3(%arg0: i32, %arg1: i32, %arg2: i32) -> (i32, i32) {
    %c0_i32 = arith.constant 0 : i32
    return %arg0, %arg1 : i32, i32
  }
}

module attributes {stable_mosaic.version = 11 : i64} {
  func.func @_stats_kernel(%arg0: i32, %arg1: i32, %arg2: memref<1x64x8xf32, #tpu.memory_space<vmem>>, %arg3: memref<1x64x8xf32, #tpu.memory_space<vmem>>, %arg4: memref<1x8x8xf32, #tpu.memory_space<vmem>>) attributes {dimension_semantics = [#tpu.dimension_semantics<parallel>, #tpu.dimension_semantics<arbitrary>], iteration_bounds = array<i64: 2, 1>, scalar_prefetch = 0 : i64, scratch_operands = 0 : i64, tpu.core_type = #tpu.core_type<tc>, window_params = [{transform_indices = @transform_0, window_bounds = array<i64: 1, 64, 8>}, {transform_indices = @transform_1, window_bounds = array<i64: 1, 64, 8>}, {transform_indices = @transform_2, window_bounds = array<i64: 1, 8, 8>}]} {
    %c0_i32 = arith.constant 0 : i32
    %0 = arith.cmpi eq, %arg1, %c0_i32 : i32
    %1 = arith.extui %0 : i1 to i32
    %c0_i32_0 = arith.constant 0 : i32
    %2 = arith.cmpi ne, %1, %c0_i32_0 : i32
    scf.if %2 {
      %cst_36 = arith.constant 0.000000e+00 : f32
      %34 = vector.broadcast %cst_36 : f32 to vector<1x8x8xf32>
      %c0_37 = arith.constant 0 : index
      %c0_38 = arith.constant 0 : index
      %c0_39 = arith.constant 0 : index
      %35 = vector.load %arg4[%c0_37, %c0_38, %c0_39] : memref<1x8x8xf32, #tpu.memory_space<vmem>>, vector<1x8x8xf32>
      tpu.vector_store %arg4[%c0_37, %c0_38, %c0_39], %34 {strides = array<i32>} : memref<1x8x8xf32, #tpu.memory_space<vmem>>, vector<1x8x8xf32>,
    } else {
    }
    %c0 = arith.constant 0 : index
    %c0_1 = arith.constant 0 : index
    %c0_2 = arith.constant 0 : index
    %3 = vector.load %arg2[%c0, %c0_1, %c0_2] : memref<1x64x8xf32, #tpu.memory_space<vmem>>, vector<1x64x8xf32>
    %c0_3 = arith.constant 0 : index
    %c0_4 = arith.constant 0 : index
    %c0_5 = arith.constant 0 : index
    %4 = vector.load %arg3[%c0_3, %c0_4, %c0_5] : memref<1x64x8xf32, #tpu.memory_space<vmem>>, vector<1x64x8xf32>
    %c0_6 = arith.constant 0 : index
    %c0_7 = arith.constant 0 : index
    %c0_8 = arith.constant 0 : index
    %5 = vector.load %arg4[%c0_6, %c0_7, %c0_8] : memref<1x8x8xf32, #tpu.memory_space<vmem>>, vector<1x1x8xf32>
    %cst = arith.constant dense<0.000000e+00> : vector<1x8xf32>
    %6 = vector.multi_reduction <add>, %3, %cst [1] : vector<1x64x8xf32> to vector<1x8xf32>
    %7 = vector.shape_cast %6 : vector<1x8xf32> to vector<1x1x8xf32>
    %8 = arith.addf %5, %7 : vector<1x1x8xf32>
    %c0_9 = arith.constant 0 : index
    %c0_10 = arith.constant 0 : index
    %c0_11 = arith.constant 0 : index
    %9 = vector.load %arg4[%c0_9, %c0_10, %c0_11] : memref<1x8x8xf32, #tpu.memory_space<vmem>>, vector<1x1x8xf32>
    tpu.vector_store %arg4[%c0_9, %c0_10, %c0_11], %8 {strides = array<i32>} : memref<1x8x8xf32, #tpu.memory_space<vmem>>, vector<1x1x8xf32>,
    %c0_12 = arith.constant 0 : index
    %c1 = arith.constant 1 : index
    %c0_13 = arith.constant 0 : index
    %10 = vector.load %arg4[%c0_12, %c1, %c0_13] : memref<1x8x8xf32, #tpu.memory_space<vmem>>, vector<1x1x8xf32>
    %11 = arith.mulf %3, %3 : vector<1x64x8xf32>
    %cst_14 = arith.constant dense<0.000000e+00> : vector<1x8xf32>
    %12 = vector.multi_reduction <add>, %11, %cst_14 [1] : vector<1x64x8xf32> to vector<1x8xf32>
    %13 = vector.shape_cast %12 : vector<1x8xf32> to vector<1x1x8xf32>
    %14 = arith.addf %10, %13 : vector<1x1x8xf32>
    %c0_15 = arith.constant 0 : index
    %c1_16 = arith.constant 1 : index
    %c0_17 = arith.constant 0 : index
    %15 = vector.load %arg4[%c0_15, %c1_16, %c0_17] : memref<1x8x8xf32, #tpu.memory_space<vmem>>, vector<1x1x8xf32>
    tpu.vector_store %arg4[%c0_15, %c1_16, %c0_17], %14 {strides = array<i32>} : memref<1x8x8xf32, #tpu.memory_space<vmem>>, vector<1x1x8xf32>,
    %c0_18 = arith.constant 0 : index
    %c2 = arith.constant 2 : index
    %c0_19 = arith.constant 0 : index
    %16 = vector.load %arg4[%c0_18, %c2, %c0_19] : memref<1x8x8xf32, #tpu.memory_space<vmem>>, vector<1x1x8xf32>
    %cst_20 = arith.constant dense<0.000000e+00> : vector<1x8xf32>
    %17 = vector.multi_reduction <add>, %4, %cst_20 [1] : vector<1x64x8xf32> to vector<1x8xf32>
    %18 = vector.shape_cast %17 : vector<1x8xf32> to vector<1x1x8xf32>
    %19 = arith.addf %16, %18 : vector<1x1x8xf32>
    %c0_21 = arith.constant 0 : index
    %c2_22 = arith.constant 2 : index
    %c0_23 = arith.constant 0 : index
    %20 = vector.load %arg4[%c0_21, %c2_22, %c0_23] : memref<1x8x8xf32, #tpu.memory_space<vmem>>, vector<1x1x8xf32>
    tpu.vector_store %arg4[%c0_21, %c2_22, %c0_23], %19 {strides = array<i32>} : memref<1x8x8xf32, #tpu.memory_space<vmem>>, vector<1x1x8xf32>,
    %c0_24 = arith.constant 0 : index
    %c3 = arith.constant 3 : index
    %c0_25 = arith.constant 0 : index
    %21 = vector.load %arg4[%c0_24, %c3, %c0_25] : memref<1x8x8xf32, #tpu.memory_space<vmem>>, vector<1x1x8xf32>
    %22 = arith.mulf %4, %4 : vector<1x64x8xf32>
    %cst_26 = arith.constant dense<0.000000e+00> : vector<1x8xf32>
    %23 = vector.multi_reduction <add>, %22, %cst_26 [1] : vector<1x64x8xf32> to vector<1x8xf32>
    %24 = vector.shape_cast %23 : vector<1x8xf32> to vector<1x1x8xf32>
    %25 = arith.addf %21, %24 : vector<1x1x8xf32>
    %c0_27 = arith.constant 0 : index
    %c3_28 = arith.constant 3 : index
    %c0_29 = arith.constant 0 : index
    %26 = vector.load %arg4[%c0_27, %c3_28, %c0_29] : memref<1x8x8xf32, #tpu.memory_space<vmem>>, vector<1x1x8xf32>
    tpu.vector_store %arg4[%c0_27, %c3_28, %c0_29], %25 {strides = array<i32>} : memref<1x8x8xf32, #tpu.memory_space<vmem>>, vector<1x1x8xf32>,
    %c0_30 = arith.constant 0 : index
    %c4 = arith.constant 4 : index
    %c0_31 = arith.constant 0 : index
    %27 = vector.load %arg4[%c0_30, %c4, %c0_31] : memref<1x8x8xf32, #tpu.memory_space<vmem>>, vector<1x1x8xf32>
    %28 = arith.subf %3, %4 : vector<1x64x8xf32>
    %29 = math.absf %28 : vector<1x64x8xf32>
    %cst_32 = arith.constant dense<0.000000e+00> : vector<1x8xf32>
    %30 = vector.multi_reduction <add>, %29, %cst_32 [1] : vector<1x64x8xf32> to vector<1x8xf32>
    %31 = vector.shape_cast %30 : vector<1x8xf32> to vector<1x1x8xf32>
    %32 = arith.addf %27, %31 : vector<1x1x8xf32>
    %c0_33 = arith.constant 0 : index
    %c4_34 = arith.constant 4 : index
    %c0_35 = arith.constant 0 : index
    %33 = vector.load %arg4[%c0_33, %c4_34, %c0_35] : memref<1x8x8xf32, #tpu.memory_space<vmem>>, vector<1x1x8xf32>
    tpu.vector_store %arg4[%c0_33, %c4_34, %c0_35], %32 {strides = array<i32>} : memref<1x8x8xf32, #tpu.memory_space<vmem>>, vector<1x1x8xf32>,
    return
  }
  func.func @transform_0(%arg0: i32, %arg1: i32) -> (i32, i32, i32) {
    %c0_i32 = arith.constant 0 : i32
    %c0_i32_0 = arith.constant 0 : i32
    return %arg0, %arg1, %c0_i32 : i32, i32, i32
  }
  func.func @transform_1(%arg0: i32, %arg1: i32) -> (i32, i32, i32) {
    %c2_i32 = arith.constant 2 : i32
    %0 = arith.addi %arg0, %c2_i32 : i32
    %c0_i32 = arith.constant 0 : i32
    %c0_i32_0 = arith.constant 0 : i32
    return %0, %arg1, %c0_i32 : i32, i32, i32
  }
  func.func @transform_2(%arg0: i32, %arg1: i32) -> (i32, i32, i32) {
    %c0_i32 = arith.constant 0 : i32
    %c0_i32_0 = arith.constant 0 : i32
    %c0_i32_1 = arith.constant 0 : i32
    return %arg0, %c0_i32, %c0_i32_0 : i32, i32, i32
  }
}

module attributes {stable_mosaic.version = 11 : i64} {
  func.func @_affine_relu_kernel(%arg0: i32, %arg1: i32, %arg2: memref<1x64x8xf32, #tpu.memory_space<vmem>>, %arg3: memref<1x1x8xf32, #tpu.memory_space<vmem>>, %arg4: memref<1x1x8xf32, #tpu.memory_space<vmem>>, %arg5: memref<1x64x8xbf16, #tpu.memory_space<vmem>>) attributes {dimension_semantics = [#tpu.dimension_semantics<parallel>, #tpu.dimension_semantics<parallel>], iteration_bounds = array<i64: 4, 1>, scalar_prefetch = 0 : i64, scratch_operands = 0 : i64, tpu.core_type = #tpu.core_type<tc>, window_params = [{transform_indices = @transform_0, window_bounds = array<i64: 1, 64, 8>}, {transform_indices = @transform_1, window_bounds = array<i64: 1, 1, 8>}, {transform_indices = @transform_2, window_bounds = array<i64: 1, 1, 8>}, {transform_indices = @transform_3, window_bounds = array<i64: 1, 64, 8>}]} {
    %c0 = arith.constant 0 : index
    %c0_0 = arith.constant 0 : index
    %c0_1 = arith.constant 0 : index
    %0 = vector.load %arg2[%c0, %c0_0, %c0_1] : memref<1x64x8xf32, #tpu.memory_space<vmem>>, vector<1x64x8xf32>
    %c0_2 = arith.constant 0 : index
    %c0_3 = arith.constant 0 : index
    %c0_4 = arith.constant 0 : index
    %1 = vector.load %arg3[%c0_2, %c0_3, %c0_4] : memref<1x1x8xf32, #tpu.memory_space<vmem>>, vector<1x1x8xf32>
    %2 = vector.broadcast %1 : vector<1x1x8xf32> to vector<1x64x8xf32>
    %3 = arith.mulf %0, %2 : vector<1x64x8xf32>
    %c0_5 = arith.constant 0 : index
    %c0_6 = arith.constant 0 : index
    %c0_7 = arith.constant 0 : index
    %4 = vector.load %arg4[%c0_5, %c0_6, %c0_7] : memref<1x1x8xf32, #tpu.memory_space<vmem>>, vector<1x1x8xf32>
    %5 = vector.broadcast %4 : vector<1x1x8xf32> to vector<1x64x8xf32>
    %6 = arith.addf %3, %5 : vector<1x64x8xf32>
    %cst = arith.constant 0.000000e+00 : f32
    %7 = vector.broadcast %cst : f32 to vector<1x64x8xf32>
    %8 = arith.maximumf %6, %7 : vector<1x64x8xf32>
    %9 = arith.truncf %8 : vector<1x64x8xf32> to vector<1x64x8xbf16>
    %c0_8 = arith.constant 0 : index
    %c0_9 = arith.constant 0 : index
    %c0_10 = arith.constant 0 : index
    %10 = vector.load %arg5[%c0_8, %c0_9, %c0_10] : memref<1x64x8xbf16, #tpu.memory_space<vmem>>, vector<1x64x8xbf16>
    tpu.vector_store %arg5[%c0_8, %c0_9, %c0_10], %9 {strides = array<i32>} : memref<1x64x8xbf16, #tpu.memory_space<vmem>>, vector<1x64x8xbf16>,
    return
  }
  func.func @transform_0(%arg0: i32, %arg1: i32) -> (i32, i32, i32) {
    %c0_i32 = arith.constant 0 : i32
    %c0_i32_0 = arith.constant 0 : i32
    return %arg0, %arg1, %c0_i32 : i32, i32, i32
  }
  func.func @transform_1(%arg0: i32, %arg1: i32) -> (i32, i32, i32) {
    %c0_i32 = arith.constant 0 : i32
    %c0_i32_0 = arith.constant 0 : i32
    %c0_i32_1 = arith.constant 0 : i32
    return %arg0, %c0_i32, %c0_i32_0 : i32, i32, i32
  }
  func.func @transform_2(%arg0: i32, %arg1: i32) -> (i32, i32, i32) {
    %c0_i32 = arith.constant 0 : i32
    %c0_i32_0 = arith.constant 0 : i32
    %c0_i32_1 = arith.constant 0 : i32
    return %arg0, %c0_i32, %c0_i32_0 : i32, i32, i32
  }
  func.func @transform_3(%arg0: i32, %arg1: i32) -> (i32, i32, i32) {
    %c0_i32 = arith.constant 0 : i32
    %c0_i32_0 = arith.constant 0 : i32
    return %arg0, %arg1, %c0_i32 : i32, i32, i32
  }
}

module attributes {stable_mosaic.version = 11 : i64} {
  func.func @_affine_relu_kernel(%arg0: i32, %arg1: i32, %arg2: memref<1x64x8xf32, #tpu.memory_space<vmem>>, %arg3: memref<1x1x8xf32, #tpu.memory_space<vmem>>, %arg4: memref<1x1x8xf32, #tpu.memory_space<vmem>>, %arg5: memref<1x64x8xf32, #tpu.memory_space<vmem>>) attributes {dimension_semantics = [#tpu.dimension_semantics<parallel>, #tpu.dimension_semantics<parallel>], iteration_bounds = array<i64: 4, 1>, scalar_prefetch = 0 : i64, scratch_operands = 0 : i64, tpu.core_type = #tpu.core_type<tc>, window_params = [{transform_indices = @transform_0, window_bounds = array<i64: 1, 64, 8>}, {transform_indices = @transform_1, window_bounds = array<i64: 1, 1, 8>}, {transform_indices = @transform_2, window_bounds = array<i64: 1, 1, 8>}, {transform_indices = @transform_3, window_bounds = array<i64: 1, 64, 8>}]} {
    %c0 = arith.constant 0 : index
    %c0_0 = arith.constant 0 : index
    %c0_1 = arith.constant 0 : index
    %0 = vector.load %arg2[%c0, %c0_0, %c0_1] : memref<1x64x8xf32, #tpu.memory_space<vmem>>, vector<1x64x8xf32>
    %c0_2 = arith.constant 0 : index
    %c0_3 = arith.constant 0 : index
    %c0_4 = arith.constant 0 : index
    %1 = vector.load %arg3[%c0_2, %c0_3, %c0_4] : memref<1x1x8xf32, #tpu.memory_space<vmem>>, vector<1x1x8xf32>
    %2 = vector.broadcast %1 : vector<1x1x8xf32> to vector<1x64x8xf32>
    %3 = arith.mulf %0, %2 : vector<1x64x8xf32>
    %c0_5 = arith.constant 0 : index
    %c0_6 = arith.constant 0 : index
    %c0_7 = arith.constant 0 : index
    %4 = vector.load %arg4[%c0_5, %c0_6, %c0_7] : memref<1x1x8xf32, #tpu.memory_space<vmem>>, vector<1x1x8xf32>
    %5 = vector.broadcast %4 : vector<1x1x8xf32> to vector<1x64x8xf32>
    %6 = arith.addf %3, %5 : vector<1x64x8xf32>
    %cst = arith.constant 0.000000e+00 : f32
    %7 = vector.broadcast %cst : f32 to vector<1x64x8xf32>
    %8 = arith.maximumf %6, %7 : vector<1x64x8xf32>
    %c0_8 = arith.constant 0 : index
    %c0_9 = arith.constant 0 : index
    %c0_10 = arith.constant 0 : index
    %9 = vector.load %arg5[%c0_8, %c0_9, %c0_10] : memref<1x64x8xf32, #tpu.memory_space<vmem>>, vector<1x64x8xf32>
    tpu.vector_store %arg5[%c0_8, %c0_9, %c0_10], %8 {strides = array<i32>} : memref<1x64x8xf32, #tpu.memory_space<vmem>>, vector<1x64x8xf32>,
    return
  }
  func.func @transform_0(%arg0: i32, %arg1: i32) -> (i32, i32, i32) {
    %c0_i32 = arith.constant 0 : i32
    %c0_i32_0 = arith.constant 0 : i32
    return %arg0, %arg1, %c0_i32 : i32, i32, i32
  }
  func.func @transform_1(%arg0: i32, %arg1: i32) -> (i32, i32, i32) {
    %c0_i32 = arith.constant 0 : i32
    %c0_i32_0 = arith.constant 0 : i32
    %c0_i32_1 = arith.constant 0 : i32
    return %arg0, %c0_i32, %c0_i32_0 : i32, i32, i32
  }
  func.func @transform_2(%arg0: i32, %arg1: i32) -> (i32, i32, i32) {
    %c0_i32 = arith.constant 0 : i32
    %c0_i32_0 = arith.constant 0 : i32
    %c0_i32_1 = arith.constant 0 : i32
    return %arg0, %c0_i32, %c0_i32_0 : i32, i32, i32
  }
  func.func @transform_3(%arg0: i32, %arg1: i32) -> (i32, i32, i32) {
    %c0_i32 = arith.constant 0 : i32
    %c0_i32_0 = arith.constant 0 : i32
    return %arg0, %arg1, %c0_i32 : i32, i32, i32
  }
}

</mosaic_0001>

<bundles_post_ra>
// kernel: down_forward.10
= control target key start
LH: loop header
LB: loop body
LE: loop exit
PB: predicated region body
PF: predicated region fallthrough
CT: control target
= control target key end

     0   :  { %s901_s12 = smov 0   ;;  %s903_s13 = smov 0   ;;  %s993_s0 = inlined_call_operand.vmem [shape: bf16[256,128], index: 0, kind: input, shape index: {}]   ;;  %s994_s1 = inlined_call_operand.vmem [shape: bf16[128,128], index: 1, kind: input, shape index: {}]   ;;  %s995_s2 = inlined_call_operand.vmem [shape: f32[1,128], index: 2, kind: input, shape index: {}]   ;;  %s996_s3 = inlined_call_operand.vmem [shape: f32[256,128], index: 3, kind: output, shape index: {}]  }
   0x1   :  { %s905_s14 = smov 0  }
   0x2 LB: > { %s32_s15 = sadd.s32 1, %s875_s13  ;;  %p728_p0 = scmp.ge.s32.totalorder %s879_s14, 1  ;;  %s879_s14 = sphi %s905_s14, %s13_s14   ;;  %s875_s13 = sphi %s903_s13, %s998_s13   ;;  %s871_s12 = sphi %s901_s12, %s997_s12  }
   0x3   : > { %p34_p1 = scmp.ge.s32.totalorder %s32_s15, 2  ;;  %p188_p2 = scmp.lt.s32.totalorder %s879_s14, 3 }
   0x5   : > { %s1000_s15 = smov (%p34_p1, %s32_s15), 0  ;;  %p189_p3 = pnand %p728_p0, %p188_p2 }
   0x6   : > { %s729_s18 = sshll.u32 (!%p189_p3), %s871_s12, 4 }
   0x7   : > { %192 = sbr.rel (%p189_p3) target bundleno = 255 (0xff), region = 32  ;;  %p230_p4 = scmp.lt.s32.totalorder (!%p189_p3), %s729_s18, 31 }
   0xc   : > { %v841_v0 = vld [vmem:[%s994_s1 + $0x38] sm:$0xff]   ;;  %v842_v1 = vld [vmem:[%s994_s1 + $0x30] sm:$0xff]   ;;  %s1002_s18 = smov (!%p230_p4, %s729_s18), 31  ;;  %v843_v2 = vld [vmem:[%s994_s1 + $0x28] sm:$0xff]  }
   0xd   : > { %768 = vmatprep.subr.bf16.mxu0 %v841_v0  ;;  %800 = vmatprep.subr.bf16.mxu1 %v841_v0  ;;  %s730_s23 = sshll.u32 %s1002_s18, 2  ;;  %v844_v3 = vld [vmem:[%s994_s1 + $0x20] sm:$0xff]   ;;  %v845_v6 = vld [vmem:[%s994_s1 + $0x18] sm:$0xff]   ;;  %v846_v7 = vld [vmem:[%s994_s1 + $0x10] sm:$0xff]   ;;  %s732_s10 = sshll.u32 %s1002_s18, 3 }
   0xe   : > { %769 = vmatpush3.bf16.msra.mxu0 %v841_v0  ;;  %808 = vmatpush3.bf16.msra.mxu1 %v841_v0  ;;  %s934_s26 = scalar_lea.vmem %s993_s0, %s730_s23  ;;  %v847_v8 = vld [vmem:[%s994_s1 + $0x8] sm:$0xff]   ;;  %v848_v9 = vld [vmem:[%s994_s1] sm:$0xff]   ;;  %s966_s19 = scalar_lea.vmem %s996_s3, %s732_s10 }
   0xf   : > { %770 = vmatprep.subr.bf16.mxu0 %v842_v1  ;;  %801 = vmatprep.subr.bf16.mxu1 %v842_v1  ;;  %v849_v4 = vld [vmem:[%s934_s26] sm:$0xff]   ;;  %v851_v10 = vld [vmem:[%s934_s26 + $0x8] sm:$0xff]   ;;  %v853_v12 = vld [vmem:[%s934_s26 + $0x10] sm:$0xff]  }
  0x10   : > { %v850_v5 = vld [vmem:[%s934_s26 + $0x20] sm:$0xff]   ;;  %784 = vmatprep.mubr.bf16.mxu0 %v849_v4  ;;  %v852_v11 = vld [vmem:[%s934_s26 + $0x28] sm:$0xff]   ;;  %v854_v13 = vld [vmem:[%s934_s26 + $0x30] sm:$0xff]  }
  0x11   : > { %792 = vmatprep.mubr.bf16.mxu1 %v850_v5  ;;  %v855_v14 = vld [vmem:[%s934_s26 + $0x18] sm:$0xff]   ;;  %v749_v17 = vld [vmem:[%s995_s2] ss:$0 sm:$0xff] }
  0x12   : > { %771 = vmatpush3.bf16.msra.mxu0 %v842_v1  ;;  %809 = vmatpush3.bf16.msra.mxu1 %v842_v1  ;;  %v856_v15 = vld [vmem:[%s934_s26 + $0x38] sm:$0xff]  }
  0x13   : > { %772 = vmatprep.subr.bf16.mxu0 %v843_v2  ;;  %802 = vmatprep.subr.bf16.mxu1 %v843_v2 }
  0x16   : > { %773 = vmatpush3.bf16.msra.mxu0 %v843_v2  ;;  %810 = vmatpush3.bf16.msra.mxu1 %v843_v2 }
  0x17   : > { %774 = vmatprep.subr.bf16.mxu0 %v844_v3  ;;  %803 = vmatprep.subr.bf16.mxu1 %v844_v3 }
  0x1a   : > { %775 = vmatpush3.bf16.msra.mxu0 %v844_v3  ;;  %811 = vmatpush3.bf16.msra.mxu1 %v844_v3 }
  0x1b   : > { %776 = vmatprep.subr.bf16.mxu0 %v845_v6  ;;  %804 = vmatprep.subr.bf16.mxu1 %v845_v6 }
  0x1e   : > { %777 = vmatpush3.bf16.msra.mxu0 %v845_v6  ;;  %812 = vmatpush3.bf16.msra.mxu1 %v845_v6 }
  0x1f   : > { %778 = vmatprep.subr.bf16.mxu0 %v846_v7  ;;  %805 = vmatprep.subr.bf16.mxu1 %v846_v7 }
  0x22   : > { %779 = vmatpush3.bf16.msra.mxu0 %v846_v7  ;;  %813 = vmatpush3.bf16.msra.mxu1 %v846_v7 }
  0x23   : > { %780 = vmatprep.subr.bf16.mxu0 %v847_v8  ;;  %806 = vmatprep.subr.bf16.mxu1 %v847_v8 }
  0x26   : > { %781 = vmatpush3.bf16.msra.mxu0 %v847_v8  ;;  %814 = vmatpush3.bf16.msra.mxu1 %v847_v8 }
  0x27   : > { %782 = vmatprep.subr.bf16.mxu0 %v848_v9  ;;  %807 = vmatprep.subr.bf16.mxu1 %v848_v9 }
  0x2a   : > { %783 = vmatpush3.bf16.msra.mxu0 %v848_v9  ;;  %815 = vmatpush3.bf16.msra.mxu1 %v848_v9 }
  0x2d   : > { %785 = vmatmul.mubr.bf16.vlgmr.msra.gmra.mxu0 %v851_v10  ;;  %793 = vmatmul.mubr.bf16.vlgmr.msra.gmra.mxu1 %v852_v11 }
  0x2e   : > { %788 = vmatprep.mubr.bf16.mxu0 %v853_v12  ;;  %796 = vmatprep.mubr.bf16.mxu1 %v854_v13 }
  0x35   : > { %789 = vmatmul.mubr.bf16.gmra.mxu0 %v855_v14  ;;  %797 = vmatmul.mubr.bf16.gmra.mxu1 %v856_v15 }
  0xed   : > { %v786_v16 = vpop.f32.mrf.mxu0  ;;  %v794_v18 = vpop.f32.mrf.mxu1 }
  0xee   : > { %v581_v21 = vadd.f32 %v786_v16, %v749_v17  ;;  %v589_v22 = vadd.f32 %v794_v18, %v749_v17 }
  0xef   : > { %v458_v19 = vpop.f32.mrf.mxu0  ;;  %v490_v20 = vpop.f32.mrf.mxu1 }
  0xf0   : > { %597 = vst [vmem:[%s966_s19 + $0x10] sm:$0xff] %v581_v21  ;;  %605 = vst [vmem:[%s966_s19 + $0x50] sm:$0xff] %v589_v22  ;;  %v579_v25 = vadd.f32 %v749_v17, %v458_v19  ;;  %v587_v26 = vadd.f32 %v749_v17, %v490_v20 }
  0xf1   : > { %v787_v23 = vpop.f32.mrf.mxu0  ;;  %v795_v24 = vpop.f32.mrf.mxu1 }
  0xf2   : > { %595 = vst [vmem:[%s966_s19] sm:$0xff] %v579_v25  ;;  %603 = vst [vmem:[%s966_s19 + $0x40] sm:$0xff] %v587_v26  ;;  %v582_v29 = vadd.f32 %v787_v23, %v749_v17  ;;  %v590_v30 = vadd.f32 %v795_v24, %v749_v17 }
  0xf3   : > { %v461_v27 = vpop.f32.mrf.mxu0  ;;  %v493_v28 = vpop.f32.mrf.mxu1 }
  0xf4   : > { %598 = vst [vmem:[%s966_s19 + $0x18] sm:$0xff] %v582_v29  ;;  %606 = vst [vmem:[%s966_s19 + $0x58] sm:$0xff] %v590_v30  ;;  %v580_v33 = vadd.f32 %v749_v17, %v461_v27  ;;  %v588_v34 = vadd.f32 %v749_v17, %v493_v28 }
  0xf5   : > { %v790_v31 = vpop.f32.mrf.mxu0  ;;  %v798_v32 = vpop.f32.mrf.mxu1 }
  0xf6   : > { %596 = vst [vmem:[%s966_s19 + $0x8] sm:$0xff] %v580_v33  ;;  %604 = vst [vmem:[%s966_s19 + $0x48] sm:$0xff] %v588_v34  ;;  %v585_v37 = vadd.f32 %v790_v31, %v749_v17  ;;  %v593_v38 = vadd.f32 %v798_v32, %v749_v17 }
  0xf7   : > { %v474_v35 = vpop.f32.mrf.mxu0  ;;  %v506_v36 = vpop.f32.mrf.mxu1 }
  0xf8   : > { %601 = vst [vmem:[%s966_s19 + $0x30] sm:$0xff] %v585_v37  ;;  %609 = vst [vmem:[%s966_s19 + $0x70] sm:$0xff] %v593_v38  ;;  %v583_v41 = vadd.f32 %v749_v17, %v474_v35  ;;  %v591_v42 = vadd.f32 %v749_v17, %v506_v36 }
  0xf9   : > { %v791_v39 = vpop.f32.mrf.mxu0  ;;  %v799_v40 = vpop.f32.mrf.mxu1 }
  0xfa   : > { %599 = vst [vmem:[%s966_s19 + $0x20] sm:$0xff] %v583_v41  ;;  %607 = vst [vmem:[%s966_s19 + $0x60] sm:$0xff] %v591_v42  ;;  %v586_v45 = vadd.f32 %v791_v39, %v749_v17  ;;  %v594_v46 = vadd.f32 %v799_v40, %v749_v17 }
  0xfb   : > { %v477_v43 = vpop.f32.mrf.mxu0  ;;  %v509_v44 = vpop.f32.mrf.mxu1 }
  0xfc   : > { %602 = vst [vmem:[%s966_s19 + $0x38] sm:$0xff] %v586_v45  ;;  %610 = vst [vmem:[%s966_s19 + $0x78] sm:$0xff] %v594_v46  ;;  %v584_v47 = vadd.f32 %v749_v17, %v477_v43  ;;  %v592_v48 = vadd.f32 %v749_v17, %v509_v44 }
  0xfe   : > { %600 = vst [vmem:[%s966_s19 + $0x28] sm:$0xff] %v584_v47  ;;  %608 = vst [vmem:[%s966_s19 + $0x68] sm:$0xff] %v592_v48 }
  0xff PF: > { %s13_s14 = sadd.s32 1, %s879_s14   ;;  %s997_s12 = smov %s875_s13 }
 0x100   : > { %p10_p5 = scmp.ge.s32.totalorder %s13_s14, 4   ;;  %s998_s13 = smov %s1000_s15 }
 0x102   :  { %12 = sbr.rel (!%p10_p5) target bundleno = 2 (0x2), region = 76 }

// kernel: down_forward.11
= control target key start
LH: loop header
LB: loop body
LE: loop exit
PB: predicated region body
PF: predicated region fallthrough
CT: control target
= control target key end

     0   :  { %s751_s12 = smov 0   ;;  %s753_s13 = smov 0   ;;  %s839_s0 = inlined_call_operand.vmem [shape: bf16[32,256], index: 0, kind: input, shape index: {}]   ;;  %s840_s1 = inlined_call_operand.vmem [shape: bf16[256,128], index: 1, kind: input, shape index: {}]   ;;  %s841_s2 = inlined_call_operand.vmem [shape: f32[1,128], index: 2, kind: input, shape index: {}]   ;;  %s842_s3 = inlined_call_operand.vmem [shape: bf16[32,128], index: 3, kind: output, shape index: {}]  }
   0x1   :  { %s755_s14 = smov 0  }
   0x2 LB: > { %s32_s15 = sadd.s32 1, %s725_s13  ;;  %p605_p0 = scmp.ge.s32.totalorder %s729_s14, 1  ;;  %s729_s14 = sphi %s755_s14, %s13_s14   ;;  %s725_s13 = sphi %s753_s13, %s844_s13   ;;  %s721_s12 = sphi %s751_s12, %s843_s12  }
   0x3   : > { %p34_p1 = scmp.ge.s32.totalorder %s32_s15, 2  ;;  %p191_p2 = scmp.lt.s32.totalorder %s729_s14, 3 }
   0x5   : > { %s846_s15 = smov (%p34_p1, %s32_s15), 0  ;;  %p192_p3 = pnand %p605_p0, %p191_p2 }
   0x6   : > { %s606_s18 = sshll.u32 (!%p192_p3), %s721_s12, 1 }
   0x7   : > { %195 = sbr.rel (%p192_p3) target bundleno = 251 (0xfb), region = 32  ;;  %p236_p4 = scmp.lt.s32.totalorder (!%p192_p3), %s606_s18, 3 }
   0xc   : > { %v688_v0 = vld [vmem:[%s840_s1 + $0x78] sm:$0xff]   ;;  %v690_v2 = vld [vmem:[%s840_s1 + $0x70] sm:$0xff]   ;;  %v692_v4 = vld [vmem:[%s840_s1 + $0x68] sm:$0xff]   ;;  %s848_s18 = smov (!%p236_p4, %s606_s18), 3 }
   0xd   : > { %v689_v1 = vld [vmem:[%s840_s1 + $0x38] sm:$0xff]   ;;  %642 = vmatprep.subr.bf16.mxu0 %v688_v0  ;;  %v691_v3 = vld [vmem:[%s840_s1 + $0x30] sm:$0xff]   ;;  %v693_v5 = vld [vmem:[%s840_s1 + $0x28] sm:$0xff]   ;;  %s634_s6 = sshll.u32 %s848_s18, 3  ;;  %s610_s5 = sshll.u32 %s848_s18, 2 }
   0xe   : > { %643 = vmatpush3.bf16.msra.mxu0 %v689_v1  ;;  %v694_v6 = vld [vmem:[%s840_s1 + $0x60] sm:$0xff]   ;;  %v696_v8 = vld [vmem:[%s840_s1 + $0x58] sm:$0xff]   ;;  %s243_s11 = scalar_lea.vmem %s839_s0, %s634_s6  ;;  %v698_v10 = vld [vmem:[%s840_s1 + $0x50] sm:$0xff]   ;;  %s265_s8 = scalar_lea.vmem %s842_s3, %s610_s5 }
   0xf   : > { %644 = vmatprep.subr.bf16.mxu0 %v690_v2  ;;  %v695_v7 = vld [vmem:[%s840_s1 + $0x20] sm:$0xff]   ;;  %v697_v9 = vld [vmem:[%s840_s1 + $0x18] sm:$0xff]   ;;  %v699_v12 = vld [vmem:[%s840_s1 + $0x10] sm:$0xff]  }
  0x10   : > { %v706_v11 = vld [vmem:[%s243_s11 + $0x4] ss:$8 sps:$4 sm:$0xff]   ;;  %v704_v17 = vld [vmem:[%s243_s11] ss:$8 sps:$4 sm:$0xff]  }
  0x11   : > { %448 = vmatprep.mubr.bf16.mxu0 %v706_v11  ;;  %v700_v13 = vld [vmem:[%s840_s1 + $0x48] sm:$0xff]   ;;  %v702_v15 = vld [vmem:[%s840_s1 + $0x40] sm:$0xff]  }
  0x12   : > { %645 = vmatpush3.bf16.msra.mxu0 %v691_v3  ;;  %v701_v14 = vld [vmem:[%s840_s1 + $0x8] sm:$0xff]   ;;  %v703_v16 = vld [vmem:[%s840_s1] sm:$0xff]  }
  0x13   : > { %646 = vmatprep.subr.bf16.mxu0 %v692_v4  ;;  %v629_v22 = vld [vmem:[%s841_s2] ss:$0 sm:$0xff] }
  0x16   : > { %647 = vmatpush3.bf16.msra.mxu0 %v693_v5 }
  0x17   : > { %648 = vmatprep.subr.bf16.mxu0 %v694_v6 }
  0x1a   : > { %649 = vmatpush3.bf16.msra.mxu0 %v695_v7 }
  0x1b   : > { %650 = vmatprep.subr.bf16.mxu0 %v696_v8 }
  0x1e   : > { %651 = vmatpush3.bf16.msra.mxu0 %v697_v9 }
  0x1f   : > { %652 = vmatprep.subr.bf16.mxu0 %v698_v10 }
  0x22   : > { %653 = vmatpush3.bf16.msra.mxu0 %v699_v12 }
  0x23   : > { %654 = vmatprep.subr.bf16.mxu0 %v700_v13 }
  0x26   : > { %655 = vmatpush3.bf16.msra.mxu0 %v701_v14 }
  0x27   : > { %656 = vmatprep.subr.bf16.mxu0 %v702_v15 }
  0x2a   : > { %657 = vmatpush3.bf16.msra.mxu0 %v703_v16 }
  0x2d   : > { %449 = vmatmul.mubr.bf16.vlgmr.msra.gmra.mxu0 %v704_v17 }
  0xed   : > { %v658_v18 = vpop.f32.mrf.mxu0 }
  0xef   : > { %v659_v19 = vpop.f32.mrf.mxu0 }
  0xf0   : > { %v660_v21 = vadd.f32 %v659_v19, %v658_v18 }
  0xf1   : > { %v661_v20 = vpop.f32.mrf.mxu0 }
  0xf2   : > { %v473_v25 = vadd.f32 %v660_v21, %v629_v22 }
  0xf3   : > { %v662_v23 = vpop.f32.mrf.mxu0 }
  0xf4   : > { %v663_v24 = vadd.f32 %v662_v23, %v661_v20 }
  0xf6   : > { %v474_v26 = vadd.f32 %v663_v24, %v629_v22 }
  0xf8   : > { %v640_v27 = vpack.c.bf16 %v474_v26, %v473_v25 }
  0xfa   : > { %641 = vst [vmem:[%s265_s8] sm:$0xff] %v640_v27  }
  0xfb PF: > { %s13_s14 = sadd.s32 1, %s729_s14   ;;  %s843_s12 = smov %s725_s13 }
  0xfc   : > { %p10_p5 = scmp.ge.s32.totalorder %s13_s14, 4   ;;  %s844_s13 = smov %s846_s15 }
  0xfe   :  { %12 = sbr.rel (!%p10_p5) target bundleno = 2 (0x2), region = 76 }

// kernel: down_forward.12
= control target key start
LH: loop header
LB: loop body
LE: loop exit
PB: predicated region body
PF: predicated region fallthrough
CT: control target
= control target key end

     0   :  { %v210_v0 = vmov 0.0   ;;  %vm211_vm0 = vmmov 0   ;;  %s268_s1 = inlined_call_operand.vmem [shape: bf16[128,128], index: 1, kind: input, shape index: {}]   ;;  %s269_s0 = inlined_call_operand.vmem [shape: bf16[16,128], index: 0, kind: input, shape index: {}]   ;;  %s270_s2 = inlined_call_operand.vmem [shape: f32[1,128], index: 2, kind: input, shape index: {}]   ;;  %s271_s3 = inlined_call_operand.vmem [shape: f32[16,128], index: 3, kind: output, shape index: {}]  }
   0x1   :  { %179 = vmatprep.subr.bf16.mxu0 %v210_v0  ;;  %v201_v1 = vld [vmem:[%s268_s1 + $0x38] sm:$0xff]   ;;  %195 = vmatprep.mubr.msk.bf16.mxu0 %vm211_vm0, %v210_v0  ;;  %v202_v2 = vld [vmem:[%s268_s1 + $0x30] sm:$0xff]   ;;  %v203_v3 = vld [vmem:[%s268_s1 + $0x28] sm:$0xff]  }
   0x2   :  { %180 = vmatpush3.bf16.msra.mxu0 %v201_v1  ;;  %v204_v4 = vld [vmem:[%s268_s1 + $0x20] sm:$0xff]   ;;  %v205_v5 = vld [vmem:[%s268_s1 + $0x18] sm:$0xff]   ;;  %v206_v6 = vld [vmem:[%s268_s1 + $0x10] sm:$0xff]  }
   0x3   :  { %181 = vmatprep.subr.bf16.mxu0 %v210_v0  ;;  %v207_v7 = vld [vmem:[%s268_s1 + $0x8] sm:$0xff]   ;;  %v208_v8 = vld [vmem:[%s268_s1] sm:$0xff]  }
   0x4   :  { %v209_v9 = vld [vmem:[%s269_s0] sm:$0xff]  }
   0x5   :  { %v169_v11 = vld [vmem:[%s270_s2] ss:$0 sm:$0xff] }
   0x6   :  { %182 = vmatpush3.bf16.msra.mxu0 %v202_v2 }
   0x7   :  { %183 = vmatprep.subr.bf16.mxu0 %v210_v0 }
   0xa   :  { %184 = vmatpush3.bf16.msra.mxu0 %v203_v3 }
   0xb   :  { %185 = vmatprep.subr.bf16.mxu0 %v210_v0 }
   0xe   :  { %186 = vmatpush3.bf16.msra.mxu0 %v204_v4 }
   0xf   :  { %187 = vmatprep.subr.bf16.mxu0 %v210_v0 }
  0x12   :  { %188 = vmatpush3.bf16.msra.mxu0 %v205_v5 }
  0x13   :  { %189 = vmatprep.subr.bf16.mxu0 %v210_v0 }
  0x16   :  { %190 = vmatpush3.bf16.msra.mxu0 %v206_v6 }
  0x17   :  { %191 = vmatprep.subr.bf16.mxu0 %v210_v0 }
  0x1a   :  { %192 = vmatpush3.bf16.msra.mxu0 %v207_v7 }
  0x1b   :  { %193 = vmatprep.subr.bf16.mxu0 %v210_v0 }
  0x1e   :  { %194 = vmatpush3.bf16.msra.mxu0 %v208_v8 }
  0x21   :  { %196 = vmatmul.mubr.bf16.vlgmr.msra.gmra.mxu0 %v209_v9 }
  0xe1   :  { %v129_v10 = vpop.f32.mrf.mxu0 }
  0xe2   :  { %v152_v13 = vadd.f32 %v169_v11, %v129_v10 }
  0xe3   :  { %v197_v12 = vpop.f32.mrf.mxu0 }
  0xe4   :  { %154 = vst [vmem:[%s271_s3] sm:$0xff] %v152_v13 }
  0xe5   :  { %v132_v14 = vpop.f32.mrf.mxu0 }
  0xe6   :  { %v153_v16 = vadd.f32 %v169_v11, %v132_v14 }
  0xe7   :  { %v198_v15 = vpop.f32.mrf.mxu0 }
  0xe8   :  { %155 = vst [vmem:[%s271_s3 + $0x8] sm:$0xff] %v153_v16 }

// kernel: down_forward.13
= control target key start
LH: loop header
LB: loop body
LE: loop exit
PB: predicated region body
PF: predicated region fallthrough
CT: control target
= control target key end

     0   :  { %s553_s9 = smov 0   ;;  %s555_s10 = smov 0   ;;  %s754_s0 = inlined_call_operand.vmem [shape: f32[4,64,8], index: 0, kind: input, shape index: {}, may-alias: {0,1}]   ;;  %s755_s1 = inlined_call_operand.vmem [shape: f32[4,64,8], index: 1, kind: input, shape index: {}, may-alias: {0,1}]   ;;  %s756_s2 = inlined_call_operand.vmem [shape: f32[2,8,8], index: 2, kind: output, shape index: {}]  }
   0x1   :  { %s557_s11 = smov 0  }
   0x2 LB: > { %s24_s12 = sadd.s32 1, %s531_s10  ;;  %p478_p0 = scmp.ge.s32.totalorder %s535_s11, 1  ;;  %s535_s11 = sphi %s557_s11, %s12_s11   ;;  %s531_s10 = sphi %s555_s10, %s758_s10   ;;  %s527_s9 = sphi %s553_s9, %s757_s9  }
   0x3   : > { %p26_p1 = scmp.ge.s32.totalorder %s24_s12, 2  ;;  %p152_p2 = scmp.lt.s32.totalorder %s535_s11, 3 }
   0x5   : > { %s760_s12 = smov (%p26_p1, %s24_s12), 0  ;;  %p153_p3 = pnand %p478_p0, %p152_p2 }
   0x6   : > { %p209_p4 = scmp.lt.s32.totalorder (!%p153_p3), %s527_s9, 1  ;;  %p188_p5 = scmp.lt.s32.totalorder (!%p153_p3), %s527_s9, 3 }
   0x7   : > { %156 = sbr.rel (%p153_p3) target bundleno = 71 (0x47), region = 28  ;;  %s197_s13 = sadd.s32 (!%p153_p3), 2, %s527_s9 }
   0x8   : > { %p199_p6 = scmp.lt.s32.totalorder (!%p153_p3), %s197_s13, 3 }
   0xc   : > { %s210_s14 = scalar_select %p209_p4, %s527_s9, 1  ;;  %vm217_vm0 = vcmask 64512   ;;  %v537_v0 = vmov 0.0   ;;  %vm259_vm1 = vcmask 57344  }
   0xd   : > { %s762_s9 = smov (!%p188_p5, %s527_s9), 3  ;;  %s764_s13 = smov (!%p199_p6, %s197_s13), 3 }
   0xe   : > { %s483_s15 = sshll.u32 %s210_s14, 3  ;;  %s486_s19 = sshll.u32 %s762_s9, 6 }
   0xf   : > { %s574_s18 = scalar_lea.vmem %s756_s2, %s483_s15  ;;  %s195_s22 = scalar_lea.vmem %s754_s0, %s486_s19 }
  0x10   : > { %218 = vst.msk [vmem:[%s574_s18] sm:$0xff] %vm217_vm0, %v537_v0  ;;  %v581_v1 = vld [vmem:[%s195_s22] sm:$0xff]  ;;  %v583_v2 = vld [vmem:[%s195_s22 + $0x8] sm:$0xff]  ;;  %v585_v3 = vld [vmem:[%s195_s22 + $0x10] sm:$0xff]  ;;  %s487_s23 = sshll.u32 %s764_s13, 6 }
  0x11   : > { %v237_v4 = vsel %vm217_vm0, %v581_v1, 0.0  ;;  %v238_v5 = vsel %vm217_vm0, %v583_v2, 0.0  ;;  %v240_v6 = vsel %vm217_vm0, %v585_v3, 0.0  ;;  %v262_v7 = vmul.f32 %v581_v1, %v581_v1  ;;  %v595_v8 = vld [vmem:[%s195_s22 + $0x18] sm:$0xff]  ;;  %v597_v10 = vld [vmem:[%s195_s22 + $0x20] sm:$0xff]  ;;  %v605_v14 = vld [vmem:[%s195_s22 + $0x28] sm:$0xff]  ;;  %s614_s26 = scalar_lea.vmem %s755_s1, %s487_s23 }
  0x12   : > { %v239_v9 = vadd.f32 %v238_v5, %v237_v4  ;;  %v242_v11 = vsel %vm217_vm0, %v595_v8, 0.0  ;;  %v263_v12 = vmul.f32 %v583_v2, %v583_v2  ;;  %v264_v13 = vmul.f32 %v585_v3, %v585_v3  ;;  %v622_v22 = vld [vmem:[%s195_s22 + $0x30] sm:$0xff]  ;;  %v624_v23 = vld [vmem:[%s195_s22 + $0x38] sm:$0xff]  ;;  %v637_v32 = vld [vmem:[%s614_s26] sm:$0xff] }
  0x13   : > { %v244_v16 = vsel %vm217_vm0, %v597_v10, 0.0  ;;  %v265_v17 = vmul.f32 %v595_v8, %v595_v8  ;;  %v246_v18 = vsel %vm217_vm0, %v605_v14, 0.0  ;;  %v266_v19 = vmul.f32 %v597_v10, %v597_v10  ;;  %v640_v33 = vld [vmem:[%s614_s26 + $0x8] sm:$0xff]  ;;  %v643_v36 = vld [vmem:[%s614_s26 + $0x10] sm:$0xff]  ;;  %v653_v41 = vld [vmem:[%s614_s26 + $0x18] sm:$0xff] }
  0x14   : > { %v241_v15 = vadd.f32 %v240_v6, %v239_v9  ;;  %v270_v20 = vsel %vm217_vm0, %v262_v7, 0.0  ;;  %v271_v21 = vsel %vm217_vm0, %v263_v12, 0.0  ;;  %v267_v25 = vmul.f32 %v605_v14, %v605_v14  ;;  %v662_v49 = vld [vmem:[%s614_s26 + $0x20] sm:$0xff]  ;;  %v669_v55 = vld [vmem:[%s614_s26 + $0x28] sm:$0xff]  ;;  %v677_v59 = vld [vmem:[%s614_s26 + $0x30] sm:$0xff] }
  0x15   : > { %v272_v26 = vadd.f32 %v271_v21, %v270_v20  ;;  %v273_v27 = vsel %vm217_vm0, %v264_v13, 0.0  ;;  %v248_v28 = vsel %vm217_vm0, %v622_v22, 0.0  ;;  %v250_v29 = vsel %vm217_vm0, %v624_v23, 0.0  ;;  %v687_v6 = vld [vmem:[%s614_s26 + $0x38] sm:$0xff] }
  0x16   : > { %v243_v24 = vadd.f32 %v242_v11, %v241_v15  ;;  %v268_v30 = vmul.f32 %v622_v22, %v622_v22  ;;  %v275_v31 = vsel %vm217_vm0, %v265_v17, 0.0  ;;  %v294_v37 = vsel %vm217_vm0, %v637_v32, 0.0 }
  0x17   : > { %v274_v35 = vadd.f32 %v273_v27, %v272_v26  ;;  %v295_v38 = vsel %vm217_vm0, %v640_v33, 0.0  ;;  %v269_v39 = vmul.f32 %v624_v23, %v624_v23  ;;  %v277_v40 = vsel %vm217_vm0, %v266_v19, 0.0 }
  0x18   : > { %v245_v34 = vadd.f32 %v244_v16, %v243_v24  ;;  %v296_v42 = vadd.f32 %v295_v38, %v294_v37  ;;  %v297_v43 = vsel %vm217_vm0, %v643_v36, 0.0  ;;  %v279_v46 = vsel %vm217_vm0, %v267_v25, 0.0 }
  0x19   : > { %v276_v45 = vadd.f32 %v275_v31, %v274_v35  ;;  %v299_v47 = vsel %vm217_vm0, %v653_v41, 0.0  ;;  %v281_v48 = vsel %vm217_vm0, %v268_v30, 0.0  ;;  %v318_v51 = vmul.f32 %v637_v32, %v637_v32 }
  0x1a   : > { %v247_v44 = vadd.f32 %v246_v18, %v245_v34  ;;  %v298_v50 = vadd.f32 %v297_v43, %v296_v42  ;;  %v319_v52 = vmul.f32 %v640_v33, %v640_v33  ;;  %v301_v56 = vsel %vm217_vm0, %v662_v49, 0.0 }
  0x1b   : > { %v278_v54 = vadd.f32 %v277_v40, %v276_v45  ;;  %v320_v57 = vmul.f32 %v643_v36, %v643_v36  ;;  %v283_v58 = vsel %vm217_vm0, %v269_v39, 0.0  ;;  %v303_v61 = vsel %vm217_vm0, %v669_v55, 0.0 }
  0x1c   : > { %v249_v53 = vadd.f32 %v248_v28, %v247_v44  ;;  %v300_v60 = vadd.f32 %v299_v47, %v298_v50  ;;  %v321_v62 = vmul.f32 %v653_v41, %v653_v41  ;;  %v305_v4 = vsel %vm217_vm0, %v677_v59, 0.0 }
  0x1d   : > { %v280_v0 = vadd.f32 %v279_v46, %v278_v54  ;;  %v326_v5 = vsel %vm217_vm0, %v318_v51, 0.0  ;;  %v322_v9 = vmul.f32 %v662_v49, %v662_v49  ;;  %v327_v11 = vsel %vm217_vm0, %v319_v52, 0.0  ;;  %v235_v51 = vld [vmem:[%s574_s18] sm:$0x1] }
  0x1e   : > { %v251_v63 = vadd.f32 %v250_v29, %v249_v53  ;;  %v302_v7 = vadd.f32 %v301_v56, %v300_v60  ;;  %v329_v12 = vsel %vm217_vm0, %v320_v57, 0.0  ;;  %v307_v16 = vsel %vm217_vm0, %v687_v6, 0.0 }
  0x1f   : > { %v282_v15 = vadd.f32 %v281_v48, %v280_v0  ;;  %v328_v17 = vadd.f32 %v327_v11, %v326_v5  ;;  %v323_v19 = vmul.f32 %v669_v55, %v669_v55  ;;  %v324_v20 = vmul.f32 %v677_v59, %v677_v59  ;;  %v261_v0 = vld [vmem:[%s574_s18 + $0x1] sm:$0x1] }
  0x20   : > { %v252_v13 = vrot.slane %v251_v63, 4  ;;  %v304_v18 = vadd.f32 %v303_v61, %v302_v7  ;;  %v331_v21 = vsel %vm217_vm0, %v321_v62, 0.0  ;;  %v350_v27 = vsub.f32 %v581_v1, %v637_v32 }
  0x21   : > { %v284_v25 = vadd.f32 %v283_v58, %v282_v15  ;;  %v330_v26 = vadd.f32 %v329_v12, %v328_v17  ;;  %v333_v29 = vsel %vm217_vm0, %v322_v9, 0.0  ;;  %v351_v30 = vsub.f32 %v583_v2, %v640_v33  ;;  %v293_v17 = vld [vmem:[%s574_s18 + $0x2] sm:$0x1] }
  0x22   : > { %v253_v24 = vadd.f32 %v252_v13, %v251_v63  ;;  %v306_v28 = vadd.f32 %v305_v4, %v304_v18  ;;  %v352_v31 = vsub.f32 %v585_v3, %v643_v36  ;;  %v325_v37 = vmul.f32 %v687_v6, %v687_v6 }
  0x23   : > { %v285_v35 = vrot.slane %v284_v25, 4  ;;  %v332_v38 = vadd.f32 %v331_v21, %v330_v26  ;;  %v335_v1 = vsel %vm217_vm0, %v323_v19, 0.0  ;;  %v353_v32 = vsub.f32 %v595_v8, %v653_v41 }
  0x24   : > { %v254_v34 = vrot.slane %v253_v24, 2  ;;  %v308_v39 = vadd.f32 %v307_v16, %v306_v28  ;;  %v354_v40 = vsub.f32 %v597_v10, %v662_v49  ;;  %v358_v3 = vand.u32 2147483647, %v350_v27 }
  0x25   : > { %v286_v33 = vadd.f32 %v285_v35, %v284_v25  ;;  %v334_v42 = vadd.f32 %v333_v29, %v332_v38  ;;  %v337_v43 = vsel %vm217_vm0, %v324_v20, 0.0  ;;  %v359_v44 = vand.u32 2147483647, %v351_v30 }
  0x26   : > { %v255_v2 = vadd.f32 %v254_v34, %v253_v24  ;;  %v309_v36 = vrot.slane %v308_v39, 4  ;;  %v360_v45 = vand.u32 2147483647, %v352_v31  ;;  %v339_v50 = vsel %vm217_vm0, %v325_v37, 0.0  ;;  %v317_v34 = vld [vmem:[%s574_s18 + $0x3] sm:$0x1] }
  0x27   : > { %v287_v47 = vrot.slane %v286_v33, 2  ;;  %v336_v48 = vadd.f32 %v335_v1, %v334_v42  ;;  %v355_v8 = vsub.f32 %v605_v14, %v669_v55  ;;  %v356_v10 = vsub.f32 %v622_v22, %v677_v59 }
  0x28   : > { %v256_v46 = vrot.slane %v255_v2, 1  ;;  %v310_v52 = vadd.f32 %v309_v36, %v308_v39  ;;  %v361_v41 = vand.u32 2147483647, %v353_v32  ;;  %v362_v56 = vand.u32 2147483647, %v354_v40 }
  0x29   : > { %v288_v53 = vadd.f32 %v287_v47, %v286_v33  ;;  %v338_v54 = vadd.f32 %v337_v43, %v336_v48  ;;  %v366_v58 = vsel %vm217_vm0, %v358_v3, 0.0  ;;  %v367_v60 = vsel %vm217_vm0, %v359_v44, 0.0  ;;  %v349_v33 = vld [vmem:[%s574_s18 + $0x4] sm:$0x1] }
  0x2a   : > { %v257_v49 = vadd.f32 %v256_v46, %v255_v2  ;;  %v311_v57 = vrot.slane %v310_v52, 2  ;;  %v369_v61 = vsel %vm217_vm0, %v360_v45, 0.0  ;;  %v368_v55 = vadd.f32 %v367_v60, %v366_v58 }
  0x2b   : > { %v289_v63 = vrot.slane %v288_v53, 1  ;;  %v340_v14 = vadd.f32 %v339_v50, %v338_v54  ;;  %v357_v59 = vsub.f32 %v624_v23, %v687_v6  ;;  %v363_v4 = vand.u32 2147483647, %v355_v8 }
  0x2c   : > { %v258_v62 = vadd.f32 %v257_v49, %v235_v51  ;;  %v312_v22 = vadd.f32 %v311_v57, %v310_v52  ;;  %v371_v5 = vsel %vm217_vm0, %v361_v41, 0.0  ;;  %v370_v11 = vadd.f32 %v369_v61, %v368_v55 }
  0x2d   : > { %v290_v7 = vadd.f32 %v289_v63, %v288_v53  ;;  %v341_v9 = vrot.slane %v340_v14, 4  ;;  %v364_v13 = vand.u32 2147483647, %v356_v10  ;;  %v373_v15 = vsel %vm217_vm0, %v362_v56, 0.0 }
  0x2e   : > { %260 = vst.msk [vmem:[%s574_s18] sm:$0x1] %vm259_vm1, %v258_v62  ;;  %v313_v12 = vrot.slane %v312_v22, 1  ;;  %v372_v19 = vadd.f32 %v371_v5, %v370_v11  ;;  %v365_v6 = vand.u32 2147483647, %v357_v59  ;;  %v375_v20 = vsel %vm217_vm0, %v363_v4, 0.0 }
  0x2f   : > { %v291_v16 = vadd.f32 %v290_v7, %v261_v0  ;;  %v342_v18 = vadd.f32 %v341_v9, %v340_v14  ;;  %v377_v26 = vsel %vm217_vm0, %v364_v13, 0.0 }
  0x30   : > { %v314_v23 = vadd.f32 %v313_v12, %v312_v22  ;;  %v374_v24 = vadd.f32 %v373_v15, %v372_v19  ;;  %v379_v29 = vsel %vm217_vm0, %v365_v6, 0.0 }
  0x31   : > { %292 = vst.msk [vmem:[%s574_s18 + $0x1] sm:$0x1] %vm259_vm1, %v291_v16  ;;  %v343_v21 = vrot.slane %v342_v18, 2 }
  0x32   : > { %v315_v25 = vadd.f32 %v314_v23, %v293_v17  ;;  %v376_v28 = vadd.f32 %v375_v20, %v374_v24 }
  0x33   : > { %v344_v27 = vadd.f32 %v343_v21, %v342_v18 }
  0x34   : > { %316 = vst.msk [vmem:[%s574_s18 + $0x2] sm:$0x1] %vm259_vm1, %v315_v25  ;;  %v378_v31 = vadd.f32 %v377_v26, %v376_v28 }
  0x35   : > { %v345_v30 = vrot.slane %v344_v27, 1 }
  0x36   : > { %v380_v37 = vadd.f32 %v379_v29, %v378_v31 }
  0x37   : > { %v346_v35 = vadd.f32 %v345_v30, %v344_v27 }
  0x38   : > { %v381_v39 = vrot.slane %v380_v37, 4 }
  0x39   : > { %v347_v38 = vadd.f32 %v346_v35, %v317_v34 }
  0x3a   : > { %v382_v1 = vadd.f32 %v381_v39, %v380_v37 }
  0x3b   : > { %348 = vst.msk [vmem:[%s574_s18 + $0x3] sm:$0x1] %vm259_vm1, %v347_v38 }
  0x3c   : > { %v383_v32 = vrot.slane %v382_v1, 2 }
  0x3e   : > { %v384_v40 = vadd.f32 %v383_v32, %v382_v1 }
  0x40   : > { %v385_v2 = vrot.slane %v384_v40, 1 }
  0x42   : > { %v386_v42 = vadd.f32 %v385_v2, %v384_v40 }
  0x44   : > { %v387_v3 = vadd.f32 %v386_v42, %v349_v33 }
  0x46   : > { %388 = vst.msk [vmem:[%s574_s18 + $0x4] sm:$0x1] %vm259_vm1, %v387_v3 }
  0x47 PF: > { %s12_s11 = sadd.s32 1, %s535_s11   ;;  %s757_s9 = smov %s531_s10 }
  0x48   : > { %p9_p7 = scmp.ge.s32.totalorder %s12_s11, 4   ;;  %s758_s10 = smov %s760_s12 }
  0x4a   :  { %11 = sbr.rel (!%p9_p7) target bundleno = 2 (0x2), region = 65 }

// kernel: down_forward.14
= control target key start
LH: loop header
LB: loop body
LE: loop exit
PB: predicated region body
PF: predicated region fallthrough
CT: control target
= control target key end

     0   :  { %s529_s12 = smov 0   ;;  %s531_s13 = smov 0   ;;  %s582_s0 = inlined_call_operand.vmem [shape: f32[4,64,8], index: 0, kind: input, shape index: {}]   ;;  %s583_s1 = inlined_call_operand.vmem [shape: f32[4,1,8], index: 1, kind: input, shape index: {}]   ;;  %s584_s2 = inlined_call_operand.vmem [shape: f32[4,1,8], index: 2, kind: input, shape index: {}]   ;;  %s585_s3 = inlined_call_operand.vmem [shape: bf16[4,64,8], index: 3, kind: output, shape index: {}]  }
   0x1   :  { %s533_s14 = smov 0  }
   0x2 LB: > { %s25_s15 = sadd.s32 1, %s503_s13  ;;  %p434_p0 = scmp.ge.s32.totalorder %s507_s14, 1  ;;  %s507_s14 = sphi %s533_s14, %s13_s14   ;;  %s503_s13 = sphi %s531_s13, %s587_s13   ;;  %s499_s12 = sphi %s529_s12, %s586_s12  }
   0x3   : > { %p27_p1 = scmp.ge.s32.totalorder %s25_s15, 4  ;;  %p174_p2 = scmp.lt.s32.totalorder %s507_s14, 5 }
   0x5   : > { %s589_s15 = smov (%p27_p1, %s25_s15), 0  ;;  %p175_p3 = pnand %p434_p0, %p174_p2 }
   0x6   : > { %p213_p4 = scmp.lt.s32.totalorder (!%p175_p3), %s499_s12, 3 }
   0x7   : > { %178 = sbr.rel (%p175_p3) target bundleno = 28 (0x1c), region = 32 }
   0xc   : > { %s591_s12 = smov (!%p213_p4, %s499_s12), 3  ;;  %vm316_vm0 = vcmask 60416  }
   0xd   : > { %s451_s16 = sshll.u32 %s591_s12, 6  ;;  %s224_s19 = scalar_lea.vmem %s583_s1, %s591_s12 }
   0xe   : > { %s220_s22 = scalar_lea.vmem %s582_s0, %s451_s16  ;;  %s227_s25 = scalar_lea.vmem %s584_s2, %s591_s12  ;;  %v439_v0 = vld [vmem:[%s224_s19] ss:$0 sm:$0xff] }
   0xf   : > { %v238_v1 = vld [vmem:[%s220_s22] sm:$0xff]  ;;  %v239_v3 = vld [vmem:[%s220_s22 + $0x8] sm:$0xff]  ;;  %v240_v6 = vld [vmem:[%s220_s22 + $0x10] sm:$0xff]  ;;  %s452_s26 = sshll.u32 %s591_s12, 5 }
  0x10   : > { %v440_v2 = vld [vmem:[%s227_s25] ss:$0 sm:$0xff]  ;;  %v253_v4 = vmul.f32 %v439_v0, %v238_v1  ;;  %v254_v5 = vmul.f32 %v439_v0, %v239_v3  ;;  %v241_v7 = vld [vmem:[%s220_s22 + $0x18] sm:$0xff]  ;;  %v255_v9 = vmul.f32 %v439_v0, %v240_v6  ;;  %v243_v12 = vld [vmem:[%s220_s22 + $0x28] sm:$0xff]  ;;  %s236_s29 = scalar_lea.vmem %s585_s3, %s452_s26 }
  0x11   : > { %v242_v8 = vld [vmem:[%s220_s22 + $0x20] sm:$0xff]  ;;  %v256_v10 = vmul.f32 %v439_v0, %v241_v7  ;;  %v244_v13 = vld [vmem:[%s220_s22 + $0x30] sm:$0xff]  ;;  %v245_v14 = vld [vmem:[%s220_s22 + $0x38] sm:$0xff]  ;;  %v258_v17 = vmul.f32 %v439_v0, %v243_v12 }
  0x12   : > { %v257_v11 = vmul.f32 %v439_v0, %v242_v8  ;;  %v268_v15 = vadd.f32 %v440_v2, %v253_v4  ;;  %v269_v16 = vadd.f32 %v440_v2, %v254_v5  ;;  %v259_v18 = vmul.f32 %v439_v0, %v244_v13 }
  0x13   : > { %v270_v19 = vadd.f32 %v440_v2, %v255_v9  ;;  %v271_v20 = vadd.f32 %v440_v2, %v256_v10  ;;  %v260_v22 = vmul.f32 %v439_v0, %v245_v14  ;;  %v273_v25 = vadd.f32 %v440_v2, %v258_v17 }
  0x14   : > { %v272_v21 = vadd.f32 %v440_v2, %v257_v11  ;;  %v276_v23 = vmax.f32 %v268_v15, 0.0  ;;  %v277_v24 = vmax.f32 %v269_v16, 0.0  ;;  %v274_v26 = vadd.f32 %v440_v2, %v259_v18 }
  0x15   : > { %v278_v27 = vmax.f32 %v270_v19, 0.0  ;;  %v279_v28 = vmax.f32 %v271_v20, 0.0  ;;  %v275_v30 = vadd.f32 %v440_v2, %v260_v22  ;;  %v281_v33 = vmax.f32 %v273_v25, 0.0 }
  0x16   : > { %v280_v29 = vmax.f32 %v272_v21, 0.0  ;;  %v453_v31 = vpack.c.bf16 %v276_v23, %v276_v23  ;;  %v454_v32 = vpack.c.bf16 %v277_v24, %v277_v24  ;;  %v282_v34 = vmax.f32 %v274_v26, 0.0 }
  0x17   : > { %v455_v35 = vpack.c.bf16 %v278_v27, %v278_v27  ;;  %v456_v36 = vpack.c.bf16 %v279_v28, %v279_v28  ;;  %v283_v38 = vmax.f32 %v275_v30, 0.0  ;;  %v458_v39 = vpack.c.bf16 %v281_v33, %v281_v33 }
  0x18   : > { %v457_v37 = vpack.c.bf16 %v280_v29, %v280_v29  ;;  %317 = vst.msk [vmem:[%s236_s29] sm:$0xf] %vm316_vm0, %v453_v31  ;;  %318 = vst.msk [vmem:[%s236_s29 + $0x4] sm:$0xf] %vm316_vm0, %v454_v32  ;;  %v459_v40 = vpack.c.bf16 %v282_v34, %v282_v34 }
  0x19   : > { %319 = vst.msk [vmem:[%s236_s29 + $0x8] sm:$0xf] %vm316_vm0, %v455_v35  ;;  %320 = vst.msk [vmem:[%s236_s29 + $0xc] sm:$0xf] %vm316_vm0, %v456_v36  ;;  %v460_v41 = vpack.c.bf16 %v283_v38, %v283_v38 }
  0x1a   : > { %321 = vst.msk [vmem:[%s236_s29 + $0x10] sm:$0xf] %vm316_vm0, %v457_v37  ;;  %322 = vst.msk [vmem:[%s236_s29 + $0x14] sm:$0xf] %vm316_vm0, %v458_v39 }
  0x1b   : > { %323 = vst.msk [vmem:[%s236_s29 + $0x18] sm:$0xf] %vm316_vm0, %v459_v40  ;;  %324 = vst.msk [vmem:[%s236_s29 + $0x1c] sm:$0xf] %vm316_vm0, %v460_v41 }
  0x1c PF: > { %s13_s14 = sadd.s32 1, %s507_s14   ;;  %s586_s12 = smov %s503_s13 }
  0x1d   : > { %p10_p5 = scmp.ge.s32.totalorder %s13_s14, 6   ;;  %s587_s13 = smov %s589_s15 }
  0x1f   :  { %12 = sbr.rel (!%p10_p5) target bundleno = 2 (0x2), region = 68 }

// kernel: down_forward.19
= control target key start
LH: loop header
LB: loop body
LE: loop exit
PB: predicated region body
PF: predicated region fallthrough
CT: control target
= control target key end

     0   :  { %s481_s12 = smov 0   ;;  %s483_s13 = smov 0   ;;  %s528_s0 = inlined_call_operand.vmem [shape: f32[4,64,8], index: 0, kind: input, shape index: {}]   ;;  %s529_s1 = inlined_call_operand.vmem [shape: f32[4,1,8], index: 1, kind: input, shape index: {}]   ;;  %s530_s2 = inlined_call_operand.vmem [shape: f32[4,1,8], index: 2, kind: input, shape index: {}]   ;;  %s531_s3 = inlined_call_operand.vmem [shape: f32[4,64,8], index: 3, kind: output, shape index: {}]  }
   0x1   :  { %s485_s14 = smov 0  }
   0x2 LB: > { %s25_s15 = sadd.s32 1, %s455_s13  ;;  %p402_p0 = scmp.ge.s32.totalorder %s459_s14, 1  ;;  %s459_s14 = sphi %s485_s14, %s13_s14   ;;  %s455_s13 = sphi %s483_s13, %s533_s13   ;;  %s451_s12 = sphi %s481_s12, %s532_s12  }
   0x3   : > { %p27_p1 = scmp.ge.s32.totalorder %s25_s15, 4  ;;  %p174_p2 = scmp.lt.s32.totalorder %s459_s14, 5 }
   0x5   : > { %s535_s15 = smov (%p27_p1, %s25_s15), 0  ;;  %p175_p3 = pnand %p402_p0, %p174_p2 }
   0x6   : > { %p213_p4 = scmp.lt.s32.totalorder (!%p175_p3), %s451_s12, 3 }
   0x7   : > { %178 = sbr.rel (%p175_p3) target bundleno = 26 (0x1a), region = 32 }
   0xc   : > { %s537_s12 = smov (!%p213_p4, %s451_s12), 3  ;;  %vm284_vm0 = vcmask 64512  }
   0xd   : > { %s411_s16 = sshll.u32 %s537_s12, 6  ;;  %s224_s19 = scalar_lea.vmem %s529_s1, %s537_s12 }
   0xe   : > { %s220_s22 = scalar_lea.vmem %s528_s0, %s411_s16  ;;  %s227_s25 = scalar_lea.vmem %s530_s2, %s537_s12  ;;  %v407_v0 = vld [vmem:[%s224_s19] ss:$0 sm:$0xff] }
   0xf   : > { %v238_v1 = vld [vmem:[%s220_s22] sm:$0xff]  ;;  %v239_v3 = vld [vmem:[%s220_s22 + $0x8] sm:$0xff]  ;;  %v240_v6 = vld [vmem:[%s220_s22 + $0x10] sm:$0xff]  ;;  %s236_s28 = scalar_lea.vmem %s531_s3, %s411_s16 }
  0x10   : > { %v408_v2 = vld [vmem:[%s227_s25] ss:$0 sm:$0xff]  ;;  %v253_v4 = vmul.f32 %v407_v0, %v238_v1  ;;  %v254_v5 = vmul.f32 %v407_v0, %v239_v3  ;;  %v241_v7 = vld [vmem:[%s220_s22 + $0x18] sm:$0xff]  ;;  %v255_v9 = vmul.f32 %v407_v0, %v240_v6  ;;  %v243_v12 = vld [vmem:[%s220_s22 + $0x28] sm:$0xff] }
  0x11   : > { %v242_v8 = vld [vmem:[%s220_s22 + $0x20] sm:$0xff]  ;;  %v256_v10 = vmul.f32 %v407_v0, %v241_v7  ;;  %v244_v13 = vld [vmem:[%s220_s22 + $0x30] sm:$0xff]  ;;  %v245_v14 = vld [vmem:[%s220_s22 + $0x38] sm:$0xff]  ;;  %v258_v17 = vmul.f32 %v407_v0, %v243_v12 }
  0x12   : > { %v257_v11 = vmul.f32 %v407_v0, %v242_v8  ;;  %v268_v15 = vadd.f32 %v408_v2, %v253_v4  ;;  %v269_v16 = vadd.f32 %v408_v2, %v254_v5  ;;  %v259_v18 = vmul.f32 %v407_v0, %v244_v13 }
  0x13   : > { %v270_v19 = vadd.f32 %v408_v2, %v255_v9  ;;  %v271_v20 = vadd.f32 %v408_v2, %v256_v10  ;;  %v260_v22 = vmul.f32 %v407_v0, %v245_v14  ;;  %v273_v25 = vadd.f32 %v408_v2, %v258_v17 }
  0x14   : > { %v272_v21 = vadd.f32 %v408_v2, %v257_v11  ;;  %v276_v23 = vmax.f32 %v268_v15, 0.0  ;;  %v277_v24 = vmax.f32 %v269_v16, 0.0  ;;  %v274_v26 = vadd.f32 %v408_v2, %v259_v18 }
  0x15   : > { %v278_v27 = vmax.f32 %v270_v19, 0.0  ;;  %v279_v28 = vmax.f32 %v271_v20, 0.0  ;;  %v275_v30 = vadd.f32 %v408_v2, %v260_v22  ;;  %v281_v31 = vmax.f32 %v273_v25, 0.0 }
  0x16   : > { %v280_v29 = vmax.f32 %v272_v21, 0.0  ;;  %285 = vst.msk [vmem:[%s236_s28] sm:$0xff] %vm284_vm0, %v276_v23  ;;  %286 = vst.msk [vmem:[%s236_s28 + $0x8] sm:$0xff] %vm284_vm0, %v277_v24  ;;  %v282_v32 = vmax.f32 %v274_v26, 0.0 }
  0x17   : > { %287 = vst.msk [vmem:[%s236_s28 + $0x10] sm:$0xff] %vm284_vm0, %v278_v27  ;;  %288 = vst.msk [vmem:[%s236_s28 + $0x18] sm:$0xff] %vm284_vm0, %v279_v28  ;;  %v283_v33 = vmax.f32 %v275_v30, 0.0 }
  0x18   : > { %289 = vst.msk [vmem:[%s236_s28 + $0x20] sm:$0xff] %vm284_vm0, %v280_v29  ;;  %290 = vst.msk [vmem:[%s236_s28 + $0x28] sm:$0xff] %vm284_vm0, %v281_v31 }
  0x19   : > { %291 = vst.msk [vmem:[%s236_s28 + $0x30] sm:$0xff] %vm284_vm0, %v282_v32  ;;  %292 = vst.msk [vmem:[%s236_s28 + $0x38] sm:$0xff] %vm284_vm0, %v283_v33 }
  0x1a PF: > { %s13_s14 = sadd.s32 1, %s459_s14   ;;  %s532_s12 = smov %s455_s13 }
  0x1b   : > { %p10_p5 = scmp.ge.s32.totalorder %s13_s14, 6   ;;  %s533_s13 = smov %s535_s15 }
  0x1d   :  { %12 = sbr.rel (!%p10_p5) target bundleno = 2 (0x2), region = 68 }

</bundles_post_ra>
